<compile_context>
chip_gen: v6e
topology: v6e:2x2x1
jax: 0.10.0
libtpu: 0.0.40
codegen_flags: <defaults>
</compile_context>

<pallas_src>
import numpy as np
import jax
import jax.numpy as jnp
from jax.experimental import pallas as pl
from jax.experimental.pallas import tpu as pltpu

# ----------------------------- HashGrid config -----------------------------
NUM_LEVELS = 8
FEATS_PER_LEVEL = 2
LOG2_HASHMAP_SIZE = 12
TABLE_SIZE = 1 << LOG2_HASHMAP_SIZE
BASE_RESOLUTION = 16
PER_LEVEL_SCALE = 1.5
GRID_OUTPUT_DIM = NUM_LEVELS * FEATS_PER_LEVEL  # = 16

HIDDEN = 128

_RES = np.floor(BASE_RESOLUTION * PER_LEVEL_SCALE ** np.arange(NUM_LEVELS)).astype(np.float32)
_HASH_PRIME = np.uint32(2654435761)
_OFFS = np.asarray([[0, 0], [0, 1], [1, 0], [1, 1]], np.int32)  # 4 bilinear corners


# -------------------------- HashGrid encode (JAX) --------------------------
def hash_encode_T(x, tables):
    """x: (N, 2) f32 in [0,1]; tables: (L, T, F) f32 -> (L*F, N) f32, point axis LAST.

    Builds the feature tensor already transposed so the Pallas MLP sees the point
    axis on lanes with no standalone XLA transpose of the feature tensor.
    """
    L, T, F = tables.shape
    res = jnp.asarray(_RES)                                      # (L,)
    offs = jnp.asarray(_OFFS)                                    # (4, 2)

    xt = x.T                                                     # (2, N)
    pos = res[:, None, None] * xt[None, :, :]                    # (L, 2, N)
    p0 = jnp.floor(pos).astype(jnp.int32)                        # (L, 2, N)
    frac = pos - p0.astype(jnp.float32)                          # (L, 2, N)

    corner = p0[:, None, :, :] + offs[None, :, :, None]          # (L, 4, 2, N)
    cu = corner.astype(jnp.uint32)
    idx = (cu[:, :, 0, :] * jnp.uint32(1)
           ^ cu[:, :, 1, :] * jnp.uint32(_HASH_PRIME)) & jnp.uint32(T - 1)   # (L, 4, N)
    lvl_off = (jnp.arange(L, dtype=jnp.uint32) * jnp.uint32(T))[:, None, None]
    flat_idx = (idx + lvl_off).astype(jnp.int32)                 # (L, 4, N)

    flat_tab_t = tables.reshape(L * T, F).T                      # (F, L*T)
    g = jnp.take(flat_tab_t, flat_idx, axis=1)                   # (F, L, 4, N) single fused gather

    w = jnp.where(offs[None, :, :, None] == 1,
                  frac[:, None, :, :], 1.0 - frac[:, None, :, :])  # (L, 4, 2, N)
    w = w[:, :, 0, :] * w[:, :, 1, :]                            # (L, 4, N)

    feat = jnp.sum(g * w[None, ...], axis=2)                     # (F, L, N)
    return jnp.swapaxes(feat, 0, 1).reshape(L * F, xt.shape[-1])  # (L*F, N)


def hash_encode_ref(x, tables):
    """Straightforward point-axis-first encoder (reference only)."""
    L, T, F = tables.shape
    res = jnp.asarray(_RES)
    offs = jnp.asarray(_OFFS)
    pos = x[:, None, :] * res[None, :, None]                     # (N, L, 2)
    p0 = jnp.floor(pos).astype(jnp.int32)
    frac = pos - p0.astype(jnp.float32)
    corner = p0[:, :, None, :] + offs[None, None, :, :]          # (N, L, 4, 2)
    cu = corner.astype(jnp.uint32)
    idx = (cu[..., 0] ^ cu[..., 1] * jnp.uint32(_HASH_PRIME)) & jnp.uint32(T - 1)
    lvl_off = (jnp.arange(L, dtype=jnp.uint32) * jnp.uint32(T))[None, :, None]
    flat_idx = (idx + lvl_off).astype(jnp.int32)
    g = jnp.take(tables.reshape(L * T, F), flat_idx.reshape(-1), axis=0)
    g = g.reshape(flat_idx.shape + (F,))                         # (N, L, 4, F)
    w = jnp.where(offs[None, None, :, :] == 1, frac[:, :, None, :], 1.0 - frac[:, :, None, :])
    w = w[..., 0] * w[..., 1]
    feat = jnp.sum(g * w[..., None], axis=2)
    return feat.reshape(feat.shape[0], L * F)


# ------------------------------ Pallas MLP kernel ---------------------------
def mlp_kernel(ft_ref, w1t_ref, b1_ref, w2t_ref, b2_ref, w3t_ref, b3_ref, o_ref):
    # ft_ref: (D, tile_n) bf16 (cast in wrapper); weights transposed bf16;
    # b1/b2 f32 columns; b3 a (1,1) f32 SMEM scalar.  All accumulation in f32.
    f = ft_ref[...]                                                        # bf16
    h = jnp.dot(w1t_ref[...], f, preferred_element_type=jnp.float32)      # (H, tile_n)
    h = jnp.maximum(h + b1_ref[...], 0.0)
    h = jnp.dot(w2t_ref[...], h.astype(jnp.bfloat16),
                preferred_element_type=jnp.float32)                        # (H, tile_n)
    h = jnp.maximum(h + b2_ref[...], 0.0)
    o = jnp.dot(w3t_ref[...], h.astype(jnp.bfloat16),
                preferred_element_type=jnp.float32)                        # (1, tile_n)
    o_ref[...] = (o + b3_ref[0, 0]).astype(o_ref.dtype)                    # lane-dense store


def mlp_pallas(featT, w1t, b1c, w2t, b2c, w3t, b3s, *, tile_n):
    D, n_pad = featT.shape
    H = w1t.shape[0]
    assert n_pad % tile_n == 0 and tile_n % 128 == 0 and D % 8 == 0
    grid_n = n_pad // tile_n
    return pl.pallas_call(
        mlp_kernel,
        out_shape=jax.ShapeDtypeStruct((1, n_pad), jnp.float32),
        grid_spec=pltpu.PrefetchScalarGridSpec(
            num_scalar_prefetch=0,
            grid=(grid_n,),
            in_specs=[
                pl.BlockSpec((D, tile_n), lambda i: (0, i)),     # bf16 features, lane = point
                pl.BlockSpec((H, D), lambda i: (0, 0)),          # W1^T bf16, VMEM-resident
                pl.BlockSpec((H, 1), lambda i: (0, 0)),          # b1 column f32
                pl.BlockSpec((H, H), lambda i: (0, 0)),          # W2^T bf16, VMEM-resident
                pl.BlockSpec((H, 1), lambda i: (0, 0)),          # b2 column f32
                pl.BlockSpec((1, H), lambda i: (0, 0)),          # W3^T bf16
                pl.BlockSpec(memory_space=pltpu.MemorySpace.SMEM),  # b3 (1,1) f32 scalar
            ],
            out_specs=pl.BlockSpec((1, tile_n), lambda i: (0, i)),
        ),
        compiler_params=pltpu.CompilerParams(dimension_semantics=("parallel",)),
    )(featT, w1t, b1c, w2t, b2c, w3t, b3s)


def _choose_tile_n(n):
    """Large column tiles amortize per-step overhead; keep >=2 grid steps on
    multi-TensorCore chips (v4/v5p/v7x) so 'parallel' shards both cores."""
    n128 = max(128, ((n + 127) // 128) * 128)
    cap = 2048
    kind = ""
    try:
        kind = (jax.devices()[0].device_kind or "").lower()
    except Exception:
        pass
    multi_tc = any(t in kind for t in ("v7", "v4", "v5p"))
    if multi_tc and n128 >= 256:
        half = max(128, ((n128 // 2) // 128) * 128)
        return min(cap, half)
    return min(cap, n128)


# ------------------------------ Model forward -------------------------------
def pack_params(params):
    """Transpose + cast weights ONCE (outside jit) so they aren't re-packed per call."""
    tables, (w1, b1), (w2, b2), (w3, b3) = params
    return dict(
        tables=tables,
        w1t=jnp.asarray(w1.T, jnp.bfloat16), b1c=jnp.asarray(b1.T, jnp.float32),
        w2t=jnp.asarray(w2.T, jnp.bfloat16), b2c=jnp.asarray(b2.T, jnp.float32),
        w3t=jnp.asarray(w3.T, jnp.bfloat16), b3s=jnp.asarray(b3, jnp.float32).reshape(1, 1),
    )


def model_forward(x, packed):
    featT = hash_encode_T(x, packed["tables"]).astype(jnp.bfloat16)   # (D, N) bf16 (= .float() then pack)
    D, N = featT.shape
    tile_n = _choose_tile_n(N)
    n_pad = ((N + tile_n - 1) // tile_n) * tile_n
    if n_pad != N:
        featT = jnp.pad(featT, ((0, 0), (0, n_pad - N)))
    out2d = mlp_pallas(featT, packed["w1t"], packed["b1c"], packed["w2t"],
                       packed["b2c"], packed["w3t"], packed["b3s"], tile_n=tile_n)  # (1, n_pad)
    out = out2d[0]
    if n_pad != N:
        out = out[:N]
    return out.reshape(N, 1)


def reference_forward(x, params):
    tables, (w1, b1), (w2, b2), (w3, b3) = params
    feat = hash_encode_ref(x, tables)
    h = jnp.maximum(feat @ w1 + b1, 0.0)
    h = jnp.maximum(h @ w2 + b2, 0.0)
    return h @ w3 + b3


# ------------------------------ Parameter init ------------------------------
def init_linear(key, fan_in, fan_out):
    """PyTorch nn.Linear default init: U(-1/sqrt(fan_in), +1/sqrt(fan_in))."""
    kw, kb = jax.random.split(key)
    bound = 1.0 / np.sqrt(fan_in)
    w = jax.random.uniform(kw, (fan_in, fan_out), jnp.float32, -bound, bound)
    b = jax.random.uniform(kb, (1, fan_out), jnp.float32, -bound, bound)
    return w, b


# ----------------------------------- main -----------------------------------
if __name__ == "__main__":
    key = jax.random.PRNGKey(0)
    k_tab, k_l1, k_l2, k_l3, k_x = jax.random.split(key, 5)

    # Hash tables: small uniform init (Instant-NGP convention).
    tables = jax.random.uniform(
        k_tab, (NUM_LEVELS, TABLE_SIZE, FEATS_PER_LEVEL), jnp.float32, -1e-4, 1e-4
    )
    w1, b1 = init_linear(k_l1, GRID_OUTPUT_DIM, HIDDEN)
    w2, b2 = init_linear(k_l2, HIDDEN, HIDDEN)
    w3, b3 = init_linear(k_l3, HIDDEN, 1)
    params = (tables, (w1, b1), (w2, b2), (w3, b3))
    packed = pack_params(params)          # one-time weight packing, outside jit

    N = 1024
    x = jax.random.uniform(k_x, (N, 2), jnp.float32)  # 2-D coords in [0,1]

    fwd = jax.jit(model_forward)
    out = jax.block_until_ready(fwd(x, packed))
    assert out.shape == (N, 1) and out.dtype == jnp.float32

    # Cross-check the transposed-layout hash encoder against the straightforward one.
    np.testing.assert_allclose(
        np.asarray(hash_encode_T(x, tables).T),
        np.asarray(hash_encode_ref(x, tables)),
        rtol=1e-5, atol=1e-8,
    )

    # Sanity check against a pure-f32 JAX reference of the full forward
    # (loose tolerance: the kernel uses bf16 matmul inputs with f32 accumulation).
    ref = reference_forward(x, params)
    np.testing.assert_allclose(np.asarray(out), np.asarray(ref), rtol=2e-2, atol=2e-2)

    print("KERNEL_OK")
</pallas_src>

<mosaic_0001>
module attributes {stable_mosaic.version = 11 : i64} {
  func.func @mlp_kernel(%arg0: i32, %arg1: memref<16x1024xbf16, #tpu.memory_space<vmem>>, %arg2: memref<128x16xbf16, #tpu.memory_space<vmem>>, %arg3: memref<128x1xf32, #tpu.memory_space<vmem>>, %arg4: memref<128x128xbf16, #tpu.memory_space<vmem>>, %arg5: memref<128x1xf32, #tpu.memory_space<vmem>>, %arg6: memref<1x128xbf16, #tpu.memory_space<vmem>>, %arg7: memref<1x1xf32, #tpu.memory_space<smem>>, %arg8: memref<1x1024xf32, #tpu.memory_space<vmem>>) attributes {dimension_semantics = [#tpu.dimension_semantics<parallel>], iteration_bounds = array<i64: 1>, scalar_prefetch = 0 : i64, scratch_operands = 0 : i64, tpu.core_type = #tpu.core_type<tc>, window_params = [{transform_indices = @transform_0, window_bounds = array<i64: 16, 1024>}, {pipeline_mode = #tpu.pipeline_mode<synchronous>, transform_indices = @transform_1, window_bounds = array<i64: 128, 16>}, {pipeline_mode = #tpu.pipeline_mode<synchronous>, transform_indices = @transform_2, window_bounds = array<i64: 128, 1>}, {pipeline_mode = #tpu.pipeline_mode<synchronous>, transform_indices = @transform_3, window_bounds = array<i64: 128, 128>}, {pipeline_mode = #tpu.pipeline_mode<synchronous>, transform_indices = @transform_4, window_bounds = array<i64: 128, 1>}, {pipeline_mode = #tpu.pipeline_mode<synchronous>, transform_indices = @transform_5, window_bounds = array<i64: 1, 128>}, {transform_indices = @transform_6, window_bounds = array<i64: 1, 1>}, {transform_indices = @transform_7, window_bounds = array<i64: 1, 1024>}]} {
    %c0 = arith.constant 0 : index
    %c0_0 = arith.constant 0 : index
    %0 = vector.load %arg1[%c0, %c0_0] : memref<16x1024xbf16, #tpu.memory_space<vmem>>, vector<16x1024xbf16>
    %c0_1 = arith.constant 0 : index
    %c0_2 = arith.constant 0 : index
    %1 = vector.load %arg2[%c0_1, %c0_2] : memref<128x16xbf16, #tpu.memory_space<vmem>>, vector<128x16xbf16>
    %cst = arith.constant dense<0.000000e+00> : vector<128x1024xf32>
    %2 = tpu.matmul %1, %0, %cst {dimension_numbers = #tpu.dot_dimension_numbers<[1], [0], [0], [1], [0, 0, 1, 1], [], []>} : vector<128x16xbf16>, vector<16x1024xbf16>, vector<128x1024xf32> -> vector<128x1024xf32>
    %c0_3 = arith.constant 0 : index
    %c0_4 = arith.constant 0 : index
    %3 = vector.load %arg3[%c0_3, %c0_4] : memref<128x1xf32, #tpu.memory_space<vmem>>, vector<128x1xf32>
    %4 = vector.broadcast %3 : vector<128x1xf32> to vector<128x1024xf32>
    %5 = arith.addf %2, %4 : vector<128x1024xf32>
    %cst_5 = arith.constant 0.000000e+00 : f32
    %6 = vector.broadcast %cst_5 : f32 to vector<128x1024xf32>
    %7 = arith.maximumf %5, %6 : vector<128x1024xf32>
    %c0_6 = arith.constant 0 : index
    %c0_7 = arith.constant 0 : index
    %8 = vector.load %arg4[%c0_6, %c0_7] : memref<128x128xbf16, #tpu.memory_space<vmem>>, vector<128x128xbf16>
    %9 = arith.truncf %7 : vector<128x1024xf32> to vector<128x1024xbf16>
    %cst_8 = arith.constant dense<0.000000e+00> : vector<128x1024xf32>
    %10 = tpu.matmul %8, %9, %cst_8 {dimension_numbers = #tpu.dot_dimension_numbers<[1], [0], [0], [1], [0, 0, 1, 1], [], []>} : vector<128x128xbf16>, vector<128x1024xbf16>, vector<128x1024xf32> -> vector<128x1024xf32>
    %c0_9 = arith.constant 0 : index
    %c0_10 = arith.constant 0 : index
    %11 = vector.load %arg5[%c0_9, %c0_10] : memref<128x1xf32, #tpu.memory_space<vmem>>, vector<128x1xf32>
    %12 = vector.broadcast %11 : vector<128x1xf32> to vector<128x1024xf32>
    %13 = arith.addf %10, %12 : vector<128x1024xf32>
    %cst_11 = arith.constant 0.000000e+00 : f32
    %14 = vector.broadcast %cst_11 : f32 to vector<128x1024xf32>
    %15 = arith.maximumf %13, %14 : vector<128x1024xf32>
    %c0_12 = arith.constant 0 : index
    %c0_13 = arith.constant 0 : index
    %16 = vector.load %arg6[%c0_12, %c0_13] : memref<1x128xbf16, #tpu.memory_space<vmem>>, vector<1x128xbf16>
    %17 = arith.truncf %15 : vector<128x1024xf32> to vector<128x1024xbf16>
    %cst_14 = arith.constant dense<0.000000e+00> : vector<1x1024xf32>
    %18 = tpu.matmul %16, %17, %cst_14 {dimension_numbers = #tpu.dot_dimension_numbers<[1], [0], [0], [1], [0, 0, 1, 1], [], []>} : vector<1x128xbf16>, vector<128x1024xbf16>, vector<1x1024xf32> -> vector<1x1024xf32>
    %c0_15 = arith.constant 0 : index
    %c0_16 = arith.constant 0 : index
    %19 = memref.load %arg7[%c0_15, %c0_16] : memref<1x1xf32, #tpu.memory_space<smem>>
    %20 = vector.broadcast %19 : f32 to vector<1x1024xf32>
    %21 = arith.addf %18, %20 : vector<1x1024xf32>
    %c0_17 = arith.constant 0 : index
    %c0_18 = arith.constant 0 : index
    %22 = vector.load %arg8[%c0_17, %c0_18] : memref<1x1024xf32, #tpu.memory_space<vmem>>, vector<1x1024xf32>
    tpu.vector_store %arg8[%c0_17, %c0_18], %21 {strides = array<i32>} : memref<1x1024xf32, #tpu.memory_space<vmem>>, vector<1x1024xf32>,
    return
  }
  func.func @transform_0(%arg0: i32) -> (i32, i32) {
    %c0_i32 = arith.constant 0 : i32
    %c0_i32_0 = arith.constant 0 : i32
    return %c0_i32, %arg0 : i32, i32
  }
  func.func @transform_1(%arg0: i32) -> (i32, i32) {
    %c0_i32 = arith.constant 0 : i32
    %c0_i32_0 = arith.constant 0 : i32
    %c0_i32_1 = arith.constant 0 : i32
    return %c0_i32, %c0_i32_0 : i32, i32
  }
  func.func @transform_2(%arg0: i32) -> (i32, i32) {
    %c0_i32 = arith.constant 0 : i32
    %c0_i32_0 = arith.constant 0 : i32
    %c0_i32_1 = arith.constant 0 : i32
    return %c0_i32, %c0_i32_0 : i32, i32
  }
  func.func @transform_3(%arg0: i32) -> (i32, i32) {
    %c0_i32 = arith.constant 0 : i32
    %c0_i32_0 = arith.constant 0 : i32
    %c0_i32_1 = arith.constant 0 : i32
    return %c0_i32, %c0_i32_0 : i32, i32
  }
  func.func @transform_4(%arg0: i32) -> (i32, i32) {
    %c0_i32 = arith.constant 0 : i32
    %c0_i32_0 = arith.constant 0 : i32
    %c0_i32_1 = arith.constant 0 : i32
    return %c0_i32, %c0_i32_0 : i32, i32
  }
  func.func @transform_5(%arg0: i32) -> (i32, i32) {
    %c0_i32 = arith.constant 0 : i32
    %c0_i32_0 = arith.constant 0 : i32
    %c0_i32_1 = arith.constant 0 : i32
    return %c0_i32, %c0_i32_0 : i32, i32
  }
  func.func @transform_6(%arg0: i32) -> (i32, i32) {
    %c0_i32 = arith.constant 0 : i32
    %c0_i32_0 = arith.constant 0 : i32
    %c0_i32_1 = arith.constant 0 : i32
    return %c0_i32, %c0_i32_0 : i32, i32
  }
  func.func @transform_7(%arg0: i32) -> (i32, i32) {
    %c0_i32 = arith.constant 0 : i32
    %c0_i32_0 = arith.constant 0 : i32
    return %c0_i32, %arg0 : i32, i32
  }
}

</mosaic_0001>

<bundles_post_ra>
// kernel: model_forward.1
= control target key start
LH: loop header
LB: loop body
LE: loop exit
PB: predicated region body
PF: predicated region fallthrough
CT: control target
= control target key end

     0   :  { %v3391_v6 = vmov 0   ;;  %vm229_vm0 = vcmask 130048   ;;  %s3383_s0 = inlined_call_operand.vmem [shape: bf16[16,1024], index: 0, kind: input, shape index: {}]   ;;  %s3384_s1 = inlined_call_operand.vmem [shape: bf16[128,16], index: 1, kind: input, shape index: {}]   ;;  %s3385_s2 = inlined_call_operand.vmem [shape: f32[128,1], index: 2, kind: input, shape index: {}]   ;;  %s3386_s3 = inlined_call_operand.vmem [shape: bf16[128,128], index: 3, kind: input, shape index: {}]   ;;  %s3387_s4 = inlined_call_operand.vmem [shape: f32[128,1], index: 4, kind: input, shape index: {}]   ;;  %s3388_s5 = inlined_call_operand.vmem [shape: bf16[1,128], index: 5, kind: input, shape index: {}]   ;;  %s3389_s6 = inlined_call_operand.<no memory space> [shape: f32[1,1], index: 6, kind: input, shape index: {}]   ;;  %s3390_s7 = inlined_call_operand.hbm [shape: f32[1,1024], index: 7, kind: output, shape index: {}]  }
   0x1   :  { %v29_v0 = vld [vmem:[%s3383_s0] sm:$0xff]  ;;  %v30_v2 = vld [vmem:[%s3383_s0 + $0x8] sm:$0xff]  ;;  %286 = vmatprep.mubr.bf16.mxu0 %v3391_v6  ;;  %399 = vmatprep.mubr.bf16.mxu1 %v3391_v6  ;;  %v31_v10 = vld [vmem:[%s3383_s0 + $0x10] sm:$0xff] }
   0x2   :  { %v33_v1 = vld [vmem:[%s3383_s0 + $0x20] sm:$0xff]  ;;  %v34_v4 = vld [vmem:[%s3383_s0 + $0x28] sm:$0xff]  ;;  %2001 = vset.pattern.permute.xlu0 %v3391_v6  ;;  %2002 = vset.pattern.permute.xlu1 %v3391_v6  ;;  %v35_v11 = vld [vmem:[%s3383_s0 + $0x30] sm:$0xff] }
   0x3   :  { %v1951_v3 = vcombine.high %v29_v0, %v33_v1  ;;  %v1950_v5 = vcombine.low %v29_v0, %v33_v1  ;;  %v1953_v7 = vcombine.high %v30_v2, %v34_v4  ;;  %v1952_v8 = vcombine.low %v30_v2, %v34_v4  ;;  %v2103_v9 = vld [vmem:[%s3384_s1] sm:$0xff]   ;;  %v32_v14 = vld [vmem:[%s3383_s0 + $0x18] sm:$0xff]  ;;  %v67_v18 = vld [vmem:[%s3385_s2 + $0x70] sm:$0xff] }
   0x4   :  { %v1954_v12 = vcombine.low %v31_v10, %v35_v11  ;;  %v1955_v13 = vcombine.high %v31_v10, %v35_v11  ;;  %v36_v15 = vld [vmem:[%s3383_s0 + $0x38] sm:$0xff]  ;;  %v65_v19 = vld [vmem:[%s3385_s2 + $0x60] sm:$0xff]  ;;  %v2132_v20 = vld [vmem:[%s3384_s1 + $0x8] sm:$0xff]   ;;  %141 = vperm.xlu0 %2001, %v67_v18  }
   0x5   :  { %268 = vmatprep.subr.bf16.mxu0 %v1951_v3  ;;  %381 = vmatprep.subr.bf16.mxu1 %v1953_v7  ;;  %v1956_v16 = vcombine.low %v32_v14, %v36_v15  ;;  %v1957_v17 = vcombine.high %v32_v14, %v36_v15  ;;  %v68_v21 = vld [vmem:[%s3385_s2 + $0x78] sm:$0xff]  ;;  %v66_v22 = vld [vmem:[%s3385_s2 + $0x68] sm:$0xff]  ;;  %v63_v23 = vld [vmem:[%s3385_s2 + $0x50] sm:$0xff] }
   0x6   :  { %269 = vmatpush1.bf16.msra.mxu0 %v1950_v5  ;;  %382 = vmatpush1.bf16.msra.mxu1 %v1952_v8  ;;  %v64_v24 = vld [vmem:[%s3385_s2 + $0x58] sm:$0xff]  ;;  %v2155_v25 = vld [vmem:[%s3384_s1 + $0x10] sm:$0xff]   ;;  %v61_v26 = vld [vmem:[%s3385_s2 + $0x40] sm:$0xff] }
   0x7   :  { %494 = vmatprep.subr.bf16.mxu0 %v1955_v13  ;;  %607 = vmatprep.subr.bf16.mxu1 %v1957_v17  ;;  %v62_v27 = vld [vmem:[%s3385_s2 + $0x48] sm:$0xff]  ;;  %v59_v28 = vld [vmem:[%s3385_s2 + $0x30] sm:$0xff]  ;;  %v60_v29 = vld [vmem:[%s3385_s2 + $0x38] sm:$0xff] }
   0x8   :  { %131 = vperm.xlu1 %2002, %v65_v19   ;;  %146 = vperm.xlu0 %2001, %v68_v21  }
   0x9   :  { %1958 = vmatmul.mubr.msk.bf16.vlgmr.msra.gmra.mxu0 %vm229_vm0, %v2103_v9  ;;  %1966 = vmatmul.mubr.msk.bf16.vlgmr.msra.gmra.mxu1 %vm229_vm0, %v2103_v9 }
   0xa   :  { %296 = vmatprep.mubr.bf16.mxu0 %v3391_v6  ;;  %409 = vmatprep.mubr.bf16.mxu1 %v3391_v6 }
   0xb   :  { %495 = vmatpush1.bf16.msra.mxu0 %v1954_v12  ;;  %608 = vmatpush1.bf16.msra.mxu1 %v1956_v16 }
   0xc   :  { %136 = vperm.xlu1 %2002, %v66_v22   ;;  %121 = vperm.xlu0 %2001, %v63_v23  }
  0x10   :  { %126 = vperm.xlu1 %2002, %v64_v24   ;;  %111 = vperm.xlu0 %2001, %v61_v26  }
  0x11   :  { %1959 = vmatmul.mubr.msk.bf16.gmra.mxu0 %vm229_vm0, %v2132_v20  ;;  %1967 = vmatmul.mubr.msk.bf16.gmra.mxu1 %vm229_vm0, %v2132_v20 }
  0x12   :  { %306 = vmatprep.mubr.bf16.mxu0 %v3391_v6  ;;  %419 = vmatprep.mubr.bf16.mxu1 %v3391_v6 }
  0x14   :  { %116 = vperm.xlu1 %2002, %v62_v27  }
  0x19   :  { %1960 = vmatmul.mubr.msk.bf16.gmra.mxu0 %vm229_vm0, %v2155_v25  ;;  %1968 = vmatmul.mubr.msk.bf16.gmra.mxu1 %vm229_vm0, %v2155_v25 }
  0x1a   :  { %316 = vmatprep.mubr.bf16.mxu0 %v3391_v6  ;;  %429 = vmatprep.mubr.bf16.mxu1 %v3391_v6 }
  0x1b   :  { %13 = vsyncpa [#allocation4], 0  ;;  %v2178_v30 = vld [vmem:[%s3384_s1 + $0x18] sm:$0xff]   ;;  %101 = vperm.xlu0 %2001, %v59_v28   ;;  %v57_v31 = vld [vmem:[%s3385_s2 + $0x20] sm:$0xff]  ;;  %106 = vperm.xlu1 %2002, %v60_v29  }
  0x1c   :  { %v58_v32 = vld [vmem:[%s3385_s2 + $0x28] sm:$0xff]  ;;  %v55_v33 = vld [vmem:[%s3385_s2 + $0x10] sm:$0xff]  ;;  %v56_v34 = vld [vmem:[%s3385_s2 + $0x18] sm:$0xff] }
  0x1d   :  { %v2201_v35 = vld [vmem:[%s3384_s1 + $0x20] sm:$0xff]   ;;  %v54_v37 = vld [vmem:[%s3385_s2 + $0x8] sm:$0xff]  ;;  %v928_v38 = vld [vmem:[%s3387_s4 + $0x70] sm:$0xff] }
  0x1e   :  { %v53_v36 = vld [vmem:[%s3385_s2] sm:$0xff]  ;;  %v929_v39 = vld [vmem:[%s3387_s4 + $0x78] sm:$0xff]  ;;  %v2224_v40 = vld [vmem:[%s3384_s1 + $0x28] sm:$0xff]  }
  0x1f   :  { %91 = vperm.xlu0 %2001, %v57_v31   ;;  %96 = vperm.xlu1 %2002, %v58_v32   ;;  %v926_v41 = vld [vmem:[%s3387_s4 + $0x60] sm:$0xff]  ;;  %v927_v42 = vld [vmem:[%s3387_s4 + $0x68] sm:$0xff]  ;;  %v924_v43 = vld [vmem:[%s3387_s4 + $0x50] sm:$0xff] }
  0x20   :  { %v925_v44 = vld [vmem:[%s3387_s4 + $0x58] sm:$0xff]  ;;  %v2009_v45 = vld [vmem:[%s3384_s1 + $0x30] sm:$0xff]   ;;  %v922_v46 = vld [vmem:[%s3387_s4 + $0x40] sm:$0xff] }
  0x21   :  { %1961 = vmatmul.mubr.msk.bf16.gmra.mxu0 %vm229_vm0, %v2178_v30  ;;  %1969 = vmatmul.mubr.msk.bf16.gmra.mxu1 %vm229_vm0, %v2178_v30  ;;  %v923_v47 = vld [vmem:[%s3387_s4 + $0x48] sm:$0xff]  ;;  %v920_v48 = vld [vmem:[%s3387_s4 + $0x30] sm:$0xff]  ;;  %v921_v49 = vld [vmem:[%s3387_s4 + $0x38] sm:$0xff] }
  0x22   :  { %326 = vmatprep.mubr.bf16.mxu0 %v3391_v6  ;;  %439 = vmatprep.mubr.bf16.mxu1 %v3391_v6  ;;  %v2010_v50 = vld [vmem:[%s3384_s1 + $0x38] sm:$0xff]   ;;  %v918_v51 = vld [vmem:[%s3387_s4 + $0x20] sm:$0xff]  ;;  %v919_v52 = vld [vmem:[%s3387_s4 + $0x28] sm:$0xff] }
  0x23   :  { %81 = vperm.xlu0 %2001, %v55_v33   ;;  %86 = vperm.xlu1 %2002, %v56_v34   ;;  %v916_v53 = vld [vmem:[%s3387_s4 + $0x10] sm:$0xff]  ;;  %v917_v54 = vld [vmem:[%s3387_s4 + $0x18] sm:$0xff]  ;;  %v914_v55 = vld [vmem:[%s3387_s4] sm:$0xff] }
  0x24   :  { %v915_v56 = vld [vmem:[%s3387_s4 + $0x8] sm:$0xff] }
  0x27   :  { %71 = vperm.xlu0 %2001, %v53_v36   ;;  %76 = vperm.xlu1 %2002, %v54_v37  }
  0x29   :  { %1962 = vmatmul.mubr.msk.bf16.gmra.mxu0 %vm229_vm0, %v2201_v35  ;;  %1970 = vmatmul.mubr.msk.bf16.gmra.mxu1 %vm229_vm0, %v2201_v35 }
  0x2a   :  { %336 = vmatprep.mubr.bf16.mxu0 %v3391_v6  ;;  %449 = vmatprep.mubr.bf16.mxu1 %v3391_v6 }
  0x2b   :  { %1002 = vperm.xlu0 %2001, %v928_v38   ;;  %1007 = vperm.xlu1 %2002, %v929_v39  }
  0x2f   :  { %992 = vperm.xlu0 %2001, %v926_v41   ;;  %997 = vperm.xlu1 %2002, %v927_v42  }
  0x31   :  { %1963 = vmatmul.mubr.msk.bf16.gmra.mxu0 %vm229_vm0, %v2224_v40  ;;  %1971 = vmatmul.mubr.msk.bf16.gmra.mxu1 %vm229_vm0, %v2224_v40 }
  0x32   :  { %346 = vmatprep.mubr.bf16.mxu0 %v3391_v6  ;;  %459 = vmatprep.mubr.bf16.mxu1 %v3391_v6 }
  0x33   :  { %982 = vperm.xlu0 %2001, %v924_v43   ;;  %987 = vperm.xlu1 %2002, %v925_v44  }
  0x37   :  { %972 = vperm.xlu0 %2001, %v922_v46   ;;  %977 = vperm.xlu1 %2002, %v923_v47  }
  0x39   :  { %1964 = vmatmul.mubr.msk.bf16.gmra.mxu0 %vm229_vm0, %v2009_v45  ;;  %1972 = vmatmul.mubr.msk.bf16.gmra.mxu1 %vm229_vm0, %v2009_v45 }
  0x3a   :  { %356 = vmatprep.mubr.bf16.mxu0 %v3391_v6  ;;  %469 = vmatprep.mubr.bf16.mxu1 %v3391_v6 }
  0x3b   :  { %962 = vperm.xlu0 %2001, %v920_v48   ;;  %967 = vperm.xlu1 %2002, %v921_v49  }
  0x3f   :  { %952 = vperm.xlu0 %2001, %v918_v51   ;;  %957 = vperm.xlu1 %2002, %v919_v52  }
  0x41   :  { %1965 = vmatmul.mubr.msk.bf16.gmra.mxu0 %vm229_vm0, %v2010_v50  ;;  %1973 = vmatmul.mubr.msk.bf16.gmra.mxu1 %vm229_vm0, %v2010_v50 }
  0x42   :  { %512 = vmatprep.mubr.bf16.mxu0 %v3391_v6  ;;  %625 = vmatprep.mubr.bf16.mxu1 %v3391_v6 }
  0x43   :  { %942 = vperm.xlu0 %2001, %v916_v53   ;;  %947 = vperm.xlu1 %2002, %v917_v54  }
  0x47   :  { %932 = vperm.xlu0 %2001, %v914_v55   ;;  %937 = vperm.xlu1 %2002, %v915_v56  }
  0x49   :  { %1974 = vmatmul.mubr.msk.bf16.vlgmr.msra.gmra.mxu0 %vm229_vm0, %v2103_v9  ;;  %1982 = vmatmul.mubr.msk.bf16.vlgmr.msra.gmra.mxu1 %vm229_vm0, %v2103_v9 }
  0x4a   :  { %522 = vmatprep.mubr.bf16.mxu0 %v3391_v6  ;;  %635 = vmatprep.mubr.bf16.mxu1 %v3391_v6 }
  0x51   :  { %1975 = vmatmul.mubr.msk.bf16.gmra.mxu0 %vm229_vm0, %v2132_v20  ;;  %1983 = vmatmul.mubr.msk.bf16.gmra.mxu1 %vm229_vm0, %v2132_v20 }
  0x52   :  { %532 = vmatprep.mubr.bf16.mxu0 %v3391_v6  ;;  %645 = vmatprep.mubr.bf16.mxu1 %v3391_v6 }
  0x59   :  { %1976 = vmatmul.mubr.msk.bf16.gmra.mxu0 %vm229_vm0, %v2155_v25  ;;  %1984 = vmatmul.mubr.msk.bf16.gmra.mxu1 %vm229_vm0, %v2155_v25 }
  0x5a   :  { %542 = vmatprep.mubr.bf16.mxu0 %v3391_v6  ;;  %655 = vmatprep.mubr.bf16.mxu1 %v3391_v6 }
  0x61   :  { %1977 = vmatmul.mubr.msk.bf16.gmra.mxu0 %vm229_vm0, %v2178_v30  ;;  %1985 = vmatmul.mubr.msk.bf16.gmra.mxu1 %vm229_vm0, %v2178_v30 }
  0x62   :  { %552 = vmatprep.mubr.bf16.mxu0 %v3391_v6  ;;  %665 = vmatprep.mubr.bf16.mxu1 %v3391_v6 }
  0x69   :  { %1978 = vmatmul.mubr.msk.bf16.gmra.mxu0 %vm229_vm0, %v2201_v35  ;;  %1986 = vmatmul.mubr.msk.bf16.gmra.mxu1 %vm229_vm0, %v2201_v35 }
  0x6a   :  { %562 = vmatprep.mubr.bf16.mxu0 %v3391_v6  ;;  %675 = vmatprep.mubr.bf16.mxu1 %v3391_v6 }
  0x71   :  { %1979 = vmatmul.mubr.msk.bf16.gmra.mxu0 %vm229_vm0, %v2224_v40  ;;  %1987 = vmatmul.mubr.msk.bf16.gmra.mxu1 %vm229_vm0, %v2224_v40 }
  0x72   :  { %572 = vmatprep.mubr.bf16.mxu0 %v3391_v6  ;;  %685 = vmatprep.mubr.bf16.mxu1 %v3391_v6 }
  0x79   :  { %1980 = vmatmul.mubr.msk.bf16.gmra.mxu0 %vm229_vm0, %v2009_v45  ;;  %1988 = vmatmul.mubr.msk.bf16.gmra.mxu1 %vm229_vm0, %v2009_v45 }
  0x7a   :  { %582 = vmatprep.mubr.bf16.mxu0 %v3391_v6  ;;  %695 = vmatprep.mubr.bf16.mxu1 %v3391_v6 }
  0x7f   :  { %v2332_v57 = vpop.permute.xlu0 %141 }
  0x80   :  { %3460 = vst [vmem:[#allocation6_spill] sm:$0xff] %v2332_v57 }
  0x81   :  { %1981 = vmatmul.mubr.msk.bf16.gmra.mxu0 %vm229_vm0, %v2010_v50  ;;  %1989 = vmatmul.mubr.msk.bf16.gmra.mxu1 %vm229_vm0, %v2010_v50 }
  0x82   :  { %1090 = vmatprep.mubr.bf16.mxu0 %v3391_v6  ;;  %1203 = vmatprep.mubr.bf16.mxu1 %v3391_v6 }
  0x83   :  { %v2334_v58 = vpop.permute.xlu1 %131  ;;  %v2336_v59 = vpop.permute.xlu0 %146 }
  0x84   :  { %3461 = vst [vmem:[#allocation7_spill] sm:$0xff] %v2334_v58 }
  0x87   :  { %v2338_v60 = vpop.permute.xlu1 %136  ;;  %v2340_v61 = vpop.permute.xlu0 %121 }
  0x88   :  { %3462 = vst [vmem:[#allocation8_spill] sm:$0xff] %v2338_v60  ;;  %3463 = vst [vmem:[#allocation9_spill] sm:$0xff] %v2340_v61 }
  0x8b   :  { %v2342_v62 = vpop.permute.xlu1 %126  ;;  %v2344_v63 = vpop.permute.xlu0 %111 }
  0x8c   :  { %3464 = vst [vmem:[#allocation10_spill] sm:$0xff] %v2342_v62  ;;  %3465 = vst [vmem:[#allocation11_spill] sm:$0xff] %v2344_v63 }
  0x8f   :  { %v2346_v0 = vpop.permute.xlu1 %116 }
  0x90   :  { %3466 = vst [vmem:[#allocation12_spill] sm:$0xff] %v2346_v0 }
  0x96   :  { %v2348_v1 = vpop.permute.xlu0 %101  ;;  %v2350_v2 = vpop.permute.xlu1 %106 }
  0x97   :  { %3467 = vst [vmem:[#allocation13_spill] sm:$0xff] %v2348_v1  ;;  %3468 = vst [vmem:[#allocation14_spill] sm:$0xff] %v2350_v2 }
  0x9a   :  { %v2352_v3 = vpop.permute.xlu0 %91  ;;  %v2354_v4 = vpop.permute.xlu1 %96 }
  0x9b   :  { %3469 = vst [vmem:[#allocation15_spill] sm:$0xff] %v2354_v4 }
  0x9e   :  { %v2356_v5 = vpop.permute.xlu0 %81  ;;  %v2358_v7 = vpop.permute.xlu1 %86 }
  0xa2   :  { %v2360_v8 = vpop.permute.xlu0 %71  ;;  %v2364_v12 = vpop.permute.xlu1 %76 }
  0xc9   :  { %v288_v9 = vpop.f32.mrf.mxu0  ;;  %v401_v10 = vpop.f32.mrf.mxu1 }
  0xca   :  { %v289_v13 = vadd.f32 %v288_v9, %v2360_v8  ;;  %v402_v15 = vadd.f32 %v401_v10, %v2360_v8 }
  0xcb   :  { %v2362_v11 = vpop.f32.mrf.mxu0  ;;  %v2367_v14 = vpop.f32.mrf.mxu1 }
  0xcc   :  { %3470 = vst [vmem:[#allocation16_spill] sm:$0xff] %v2367_v14  ;;  %v706_v21 = vmax.f32 %v289_v13, 0.0  ;;  %v708_v24 = vmax.f32 %v402_v15, 0.0 }
  0xcd   :  { %v292_v16 = vpop.f32.mrf.mxu0  ;;  %v405_v18 = vpop.f32.mrf.mxu1 }
  0xce   :  { %v293_v17 = vadd.f32 %v292_v16, %v2364_v12  ;;  %v406_v19 = vadd.f32 %v405_v18, %v2364_v12 }
  0xcf   :  { %v294_v20 = vpop.f32.mrf.mxu0  ;;  %v2372_v23 = vpop.f32.mrf.mxu1 }
  0xd0   :  { %v714_v22 = vmax.f32 %v293_v17, 0.0  ;;  %3471 = vst [vmem:[#allocation17_spill] sm:$0xff] %v2372_v23  ;;  %v716_v25 = vmax.f32 %v406_v19, 0.0 }
  0xd1   :  { %v298_v26 = vpop.f32.mrf.mxu0  ;;  %v411_v28 = vpop.f32.mrf.mxu1 }
  0xd2   :  { %v2374_v27 = vpack.c.bf16 %v714_v22, %v706_v21  ;;  %v2376_v29 = vpack.c.bf16 %v716_v25, %v708_v24  ;;  %v299_v31 = vadd.f32 %v298_v26, %v2356_v5  ;;  %v412_v33 = vadd.f32 %v411_v28, %v2356_v5 }
  0xd3   :  { %v300_v30 = vpop.f32.mrf.mxu0  ;;  %v413_v32 = vpop.f32.mrf.mxu1 }
  0xd4   :  { %3472 = vst [vmem:[#allocation18_spill] sm:$0xff] %v2374_v27  ;;  %3473 = vst [vmem:[#allocation19_spill] sm:$0xff] %v2376_v29  ;;  %v722_v39 = vmax.f32 %v299_v31, 0.0  ;;  %v724_v42 = vmax.f32 %v412_v33, 0.0 }
  0xd5   :  { %v302_v34 = vpop.f32.mrf.mxu0  ;;  %v415_v36 = vpop.f32.mrf.mxu1 }
  0xd6   :  { %v303_v35 = vadd.f32 %v302_v34, %v2358_v7  ;;  %v416_v37 = vadd.f32 %v415_v36, %v2358_v7 }
  0xd7   :  { %v304_v38 = vpop.f32.mrf.mxu0  ;;  %v417_v41 = vpop.f32.mrf.mxu1 }
  0xd8   :  { %v730_v40 = vmax.f32 %v303_v35, 0.0  ;;  %v732_v43 = vmax.f32 %v416_v37, 0.0  ;;  %v2393_v34 = vadd.f32 %v304_v38, %v2358_v7  ;;  %v2397_v37 = vadd.f32 %v2362_v11, %v2360_v8 }
  0xd9   :  { %v308_v44 = vpop.f32.mrf.mxu0  ;;  %v421_v46 = vpop.f32.mrf.mxu1  ;;  %v2409_v6 = vadd.f32 %v417_v41, %v2358_v7 }
  0xda   :  { %v2382_v45 = vpack.c.bf16 %v730_v40, %v722_v39  ;;  %v2384_v47 = vpack.c.bf16 %v732_v43, %v724_v42  ;;  %3476 = vst [vmem:[#allocation22_spill] sm:$0xff] %v2393_v34  ;;  %3477 = vst [vmem:[#allocation23_spill] sm:$0xff] %v2397_v37  ;;  %v2400_v39 = vadd.f32 %v294_v20, %v2364_v12 }
  0xdb   :  { %v310_v48 = vpop.f32.mrf.mxu0  ;;  %v423_v49 = vpop.f32.mrf.mxu1  ;;  %v2403_v40 = vadd.f32 %v300_v30, %v2356_v5  ;;  %v2406_v43 = vadd.f32 %v413_v32, %v2356_v5  ;;  %3481 = vst [vmem:[#allocation27_spill] sm:$0xff] %v2409_v6 }
  0xdc   :  { %3474 = vst [vmem:[#allocation20_spill] sm:$0xff] %v2382_v45  ;;  %3475 = vst [vmem:[#allocation21_spill] sm:$0xff] %v2384_v47  ;;  %v2428_v47 = vadd.f32 %v308_v44, %v2352_v3 }
  0xdd   :  { %v312_v50 = vpop.f32.mrf.mxu0  ;;  %v425_v51 = vpop.f32.mrf.mxu1  ;;  %3478 = vst [vmem:[#allocation24_spill] sm:$0xff] %v2400_v39  ;;  %3479 = vst [vmem:[#allocation25_spill] sm:$0xff] %v2403_v40 }
  0xde   :  { %3480 = vst [vmem:[#allocation26_spill] sm:$0xff] %v2406_v43  ;;  %3485 = vst [vmem:[#allocation31_spill] sm:$0xff] %v2428_v47  ;;  %v2446_v45 = vadd.f32 %v312_v50, %v2354_v4 }
  0xdf   :  { %v314_v52 = vpop.f32.mrf.mxu0  ;;  %v427_v53 = vpop.f32.mrf.mxu1 }
  0xe0   :  { %v2412_v38 = vadd.f32 %v314_v52, %v2354_v4  ;;  %v2415_v29 = vadd.f32 %v427_v53, %v2354_v4  ;;  %v2431_v52 = vadd.f32 %v421_v46, %v2352_v3 }
  0xe1   :  { %v318_v54 = vpop.f32.mrf.mxu0  ;;  %v431_v55 = vpop.f32.mrf.mxu1 }
  0xe2   :  { %3482 = vst [vmem:[#allocation28_spill] sm:$0xff] %v2412_v38  ;;  %3483 = vst [vmem:[#allocation29_spill] sm:$0xff] %v2415_v29  ;;  %v2419_v27 = vadd.f32 %v318_v54, %v2348_v1  ;;  %v2461_v50 = vadd.f32 %v431_v55, %v2348_v1 }
  0xe3   :  { %v320_v56 = vpop.f32.mrf.mxu0  ;;  %v433_v9 = vpop.f32.mrf.mxu1  ;;  %3486 = vst [vmem:[#allocation32_spill] sm:$0xff] %v2431_v52 }
  0xe4   :  { %3484 = vst [vmem:[#allocation30_spill] sm:$0xff] %v2419_v27  ;;  %v2422_v30 = vadd.f32 %v320_v56, %v2348_v1  ;;  %v2425_v32 = vadd.f32 %v433_v9, %v2348_v1  ;;  %v2440_v56 = vadd.f32 %v310_v48, %v2352_v3  ;;  %v2443_v9 = vadd.f32 %v423_v49, %v2352_v3 }
  0xe5   :  { %v322_v10 = vpop.f32.mrf.mxu0  ;;  %v435_v13 = vpop.f32.mrf.mxu1 }
  0xe6   :  { %v2434_v53 = vadd.f32 %v322_v10, %v2350_v2  ;;  %v2437_v20 = vadd.f32 %v435_v13, %v2350_v2  ;;  %v2452_v10 = vadd.f32 %v425_v51, %v2354_v4 }
  0xe7   :  { %v324_v15 = vpop.f32.mrf.mxu0  ;;  %v437_v16 = vpop.f32.mrf.mxu1 }
  0xe8   :  { %3487 = vst [vmem:[#allocation33_spill] sm:$0xff] %v2434_v53  ;;  %3488 = vst [vmem:[#allocation34_spill] sm:$0xff] %v2437_v20  ;;  %v2449_v44 = vadd.f32 %v324_v15, %v2350_v2  ;;  %v2457_v48 = vadd.f32 %v437_v16, %v2350_v2 }
  0xe9   :  { %v328_v17 = vpop.f32.mrf.mxu0  ;;  %v441_v18 = vpop.f32.mrf.mxu1  ;;  %3489 = vst [vmem:[#allocation35_spill] sm:$0xff] %v2452_v10 }
  0xea   :  { %v2468_v37 = vadd.f32 %v328_v17, %v2344_v63 }
  0xeb   :  { %v330_v19 = vpop.f32.mrf.mxu0  ;;  %v443_v21 = vpop.f32.mrf.mxu1 }
  0xec   :  { %v2471_v16 = vadd.f32 %v330_v19, %v2344_v63  ;;  %v2475_v55 = vadd.f32 %v443_v21, %v2344_v63  ;;  %v2490_v21 = vadd.f32 %v441_v18, %v2344_v63 }
  0xed   :  { %v2386_v22 = vpop.f32.mrf.mxu0  ;;  %v2388_v24 = vpop.f32.mrf.mxu1 }
  0xef   :  { %v334_v25 = vpop.f32.mrf.mxu0  ;;  %v447_v26 = vpop.f32.mrf.mxu1 }
  0xf0   :  { %v2478_v15 = vadd.f32 %v334_v25, %v2346_v0  ;;  %v2483_v17 = vadd.f32 %v447_v26, %v2346_v0 }
  0xf1   :  { %v338_v28 = vpop.f32.mrf.mxu0  ;;  %v2390_v31 = vpop.f32.mrf.mxu1 }
  0xf2   :  { %v2486_v19 = vadd.f32 %v338_v28, %v2340_v61 }
  0xf3   :  { %v340_v33 = vpop.f32.mrf.mxu0  ;;  %v453_v35 = vpop.f32.mrf.mxu1 }
  0xf4   :  { %v341_v1 = vadd.f32 %v340_v33, %v2340_v61  ;;  %v2493_v25 = vadd.f32 %v453_v35, %v2340_v61  ;;  %v2505_v33 = vadd.f32 %v2386_v22, %v2346_v0  ;;  %v2520_v22 = vadd.f32 %v2390_v31, %v2340_v61 }
  0xf5   :  { %v342_v36 = vpop.f32.mrf.mxu0  ;;  %v455_v42 = vpop.f32.mrf.mxu1 }
  0xf6   :  { %v2499_v13 = vadd.f32 %v455_v42, %v2342_v62 }
  0xf7   :  { %v344_v11 = vpop.f32.mrf.mxu0  ;;  %v457_v41 = vpop.f32.mrf.mxu1 }
  0xf8   :  { %v345_v39 = vadd.f32 %v344_v11, %v2342_v62  ;;  %v2496_v11 = vadd.f32 %v342_v36, %v2342_v62  ;;  %v2508_v18 = vadd.f32 %v457_v41, %v2342_v62  ;;  %v2513_v36 = vadd.f32 %v2388_v24, %v2346_v0 }
  0xf9   :  { %v348_v54 = vpop.f32.mrf.mxu0  ;;  %v461_v46 = vpop.f32.mrf.mxu1  ;;  %v787_v41 = vmax.f32 %v341_v1, 0.0 }
  0xfa   :  { %v795_v52 = vmax.f32 %v345_v39, 0.0  ;;  %v2528_v28 = vadd.f32 %v348_v54, %v2334_v58  ;;  %v2531_v40 = vadd.f32 %v461_v46, %v2334_v58 }
  0xfb   :  { %v350_v34 = vpop.f32.mrf.mxu0  ;;  %v463_v43 = vpop.f32.mrf.mxu1 }
  0xfc   :  { %v351_v42 = vadd.f32 %v350_v34, %v2334_v58  ;;  %v464_v1 = vadd.f32 %v463_v43, %v2334_v58  ;;  %v2537_v34 = vpack.c.bf16 %v795_v52, %v787_v41 }
  0xfd   :  { %v352_v2 = vpop.f32.mrf.mxu0  ;;  %v465_v51 = vpop.f32.mrf.mxu1 }
  0xfe   :  { %v803_v43 = vmax.f32 %v351_v42, 0.0  ;;  %v353_v58 = vadd.f32 %v352_v2, %v2338_v60  ;;  %v805_v23 = vmax.f32 %v464_v1, 0.0  ;;  %v466_v52 = vadd.f32 %v465_v51, %v2338_v60 }
  0xff   :  { %v354_v49 = vpop.f32.mrf.mxu0  ;;  %v467_v26 = vpop.f32.mrf.mxu1 }
 0x100   :  { %v355_v63 = vadd.f32 %v354_v49, %v2338_v60  ;;  %v468_v0 = vadd.f32 %v467_v26, %v2338_v60 }
 0x101   :  { %v358_v35 = vpop.f32.mrf.mxu0  ;;  %v471_v14 = vpop.f32.mrf.mxu1 }
 0x102   :  { %v359_v54 = vadd.f32 %v358_v35, %v2332_v57  ;;  %v472_v49 = vadd.f32 %v471_v14, %v2332_v57  ;;  %v811_v38 = vmax.f32 %v355_v63, 0.0  ;;  %v813_v42 = vmax.f32 %v468_v0, 0.0 }
 0x103   :  { %v360_v62 = vpop.f32.mrf.mxu0  ;;  %v473_v39 = vpop.f32.mrf.mxu1 }
 0x104   :  { %v361_v29 = vadd.f32 %v360_v62, %v2332_v57  ;;  %v474_v47 = vadd.f32 %v473_v39, %v2332_v57  ;;  %v818_v10 = vmax.f32 %v359_v54, 0.0  ;;  %v810_v57 = vmax.f32 %v353_v58, 0.0 }
 0x105   :  { %v362_v31 = vpop.f32.mrf.mxu0  ;;  %v475_v61 = vpop.f32.mrf.mxu1  ;;  %v802_v58 = vmax.f32 %v2528_v28, 0.0 }
 0x106   :  { %v363_v24 = vadd.f32 %v362_v31, %v2336_v59  ;;  %v476_v46 = vadd.f32 %v475_v61, %v2336_v59  ;;  %v819_v39 = vmax.f32 %v361_v29, 0.0  ;;  %v821_v2 = vmax.f32 %v474_v47, 0.0 }
 0x107   :  { %v364_v6 = vpop.f32.mrf.mxu0  ;;  %v477_v31 = vpop.f32.mrf.mxu1 }
 0x108   :  { %v365_v62 = vadd.f32 %v364_v6, %v2336_v59  ;;  %v826_v41 = vmax.f32 %v363_v24, 0.0  ;;  %v478_v26 = vadd.f32 %v477_v31, %v2336_v59  ;;  %v828_v4 = vmax.f32 %v476_v46, 0.0 }
 0x109   :  { %v514_v35 = vpop.f32.mrf.mxu0  ;;  %v627_v20 = vpop.f32.mrf.mxu1  ;;  %v820_v6 = vmax.f32 %v472_v49, 0.0  ;;  %v812_v24 = vmax.f32 %v466_v52, 0.0  ;;  %v899_v46 = vpack.c.bf16 %v811_v38, %v803_v43  ;;  %v901_v49 = vpack.c.bf16 %v813_v42, %v805_v23 }
 0x10a   :  { %v827_v61 = vmax.f32 %v365_v62, 0.0  ;;  %v829_v53 = vmax.f32 %v478_v26, 0.0  ;;  %v515_v1 = vadd.f32 %v514_v35, %v2360_v8  ;;  %v906_v60 = vpack.c.bf16 %v826_v41, %v818_v10 }
 0x10b   :  { %v516_v14 = vpop.f32.mrf.mxu0  ;;  %v629_v51 = vpop.f32.mrf.mxu1  ;;  %v628_v63 = vadd.f32 %v627_v20, %v2360_v8  ;;  %v908_v62 = vpack.c.bf16 %v828_v4, %v820_v6  ;;  %v804_v20 = vmax.f32 %v2531_v40, 0.0 }
 0x10c   :  { %v907_v27 = vpack.c.bf16 %v827_v61, %v819_v39  ;;  %v909_v31 = vpack.c.bf16 %v829_v53, %v821_v2  ;;  %v517_v0 = vadd.f32 %v516_v14, %v2360_v8  ;;  %v630_v26 = vadd.f32 %v629_v51, %v2360_v8 }
 0x10d   :  { %v518_v29 = vpop.f32.mrf.mxu0  ;;  %v631_v54 = vpop.f32.mrf.mxu1  ;;  %v710_v38 = vmax.f32 %v515_v1, 0.0  ;;  %v712_v41 = vmax.f32 %v628_v63, 0.0  ;;  %v900_v39 = vpack.c.bf16 %v812_v24, %v804_v20  ;;  %v3493_v51 = vmax.f32 %v2508_v18, 0.0 }
 0x10e   :  { %v519_v47 = vadd.f32 %v518_v29, %v2364_v12  ;;  %1058 = vmatprep.subr.bf16.mxu0 %v907_v27  ;;  %v632_v52 = vadd.f32 %v631_v54, %v2364_v12  ;;  %1171 = vmatprep.subr.bf16.mxu1 %v909_v31  ;;  %v898_v27 = vpack.c.bf16 %v810_v57, %v802_v58  ;;  %v711_v61 = vmax.f32 %v517_v0, 0.0 }
 0x10f   :  { %v520_v53 = vpop.f32.mrf.mxu0  ;;  %1059 = vmatpush1.bf16.msra.mxu0 %v906_v60  ;;  %v633_v43 = vpop.f32.mrf.mxu1  ;;  %1172 = vmatpush1.bf16.msra.mxu1 %v908_v62  ;;  %v713_v2 = vmax.f32 %v630_v26, 0.0  ;;  %v3492_v57 = vmax.f32 %v2493_v25, 0.0  ;;  %v778_v63 = vmax.f32 %v2505_v33, 0.0  ;;  %v788_v24 = vmax.f32 %v2520_v22, 0.0 }
 0x110   :  { %v718_v4 = vmax.f32 %v519_v47, 0.0  ;;  %v521_v10 = vadd.f32 %v520_v53, %v2364_v12  ;;  %1060 = vmatprep.subr.bf16.mxu0 %v899_v46  ;;  %v720_v28 = vmax.f32 %v632_v52, 0.0  ;;  %v634_v23 = vadd.f32 %v633_v43, %v2364_v12  ;;  %1173 = vmatprep.subr.bf16.mxu1 %v901_v49 }
 0x111   :  { %v524_v35 = vpop.f32.mrf.mxu0  ;;  %v637_v40 = vpop.f32.mrf.mxu1  ;;  %v893_v31 = vpack.c.bf16 %v3493_v51, %v3492_v57  ;;  %v780_v0 = vmax.f32 %v2513_v36, 0.0  ;;  %v3495_v47 = vmax.f32 %v2486_v19, 0.0  ;;  %v3496_v25 = vmax.f32 %v2496_v11, 0.0 }
 0x112   :  { %v2558_v42 = vpack.c.bf16 %v718_v4, %v710_v38  ;;  %v719_v60 = vmax.f32 %v521_v10, 0.0  ;;  %v2560_v14 = vpack.c.bf16 %v720_v28, %v712_v41  ;;  %v721_v6 = vmax.f32 %v634_v23, 0.0 }
 0x113   :  { %v526_v1 = vpop.f32.mrf.mxu0  ;;  %1061 = vmatpush1.bf16.msra.mxu0 %v898_v27  ;;  %v525_v46 = vadd.f32 %v524_v35, %v2356_v5  ;;  %v639_v62 = vpop.f32.mrf.mxu1  ;;  %1174 = vmatpush1.bf16.msra.mxu1 %v900_v39  ;;  %v890_v18 = vpack.c.bf16 %v3496_v25, %v3495_v47  ;;  %v638_v33 = vadd.f32 %v637_v40, %v2356_v5  ;;  %v3498_v58 = vmax.f32 %v2499_v13, 0.0 }
 0x114   :  { %3490 = vst [vmem:[#allocation36_spill] sm:$0xff] %v2558_v42  ;;  %3491 = vst [vmem:[#allocation37_spill] sm:$0xff] %v2560_v14  ;;  %v2568_v29 = vpack.c.bf16 %v719_v60, %v711_v61  ;;  %1062 = vmatprep.subr.bf16.mxu0 %v2537_v34  ;;  %v2577_v54 = vpack.c.bf16 %v721_v6, %v713_v2  ;;  %1175 = vmatprep.subr.bf16.mxu1 %v893_v31  ;;  %v3499_v36 = vmax.f32 %v2471_v16, 0.0 }
 0x115   :  { %v528_v22 = vpop.f32.mrf.mxu0  ;;  %v892_v49 = vpack.c.bf16 %v3498_v58, %v788_v24  ;;  %v527_v26 = vadd.f32 %v526_v1, %v2356_v5  ;;  %v641_v52 = vpop.f32.mrf.mxu1  ;;  %v3500_v19 = vmax.f32 %v2478_v15, 0.0  ;;  %v640_v53 = vadd.f32 %v639_v62, %v2356_v5  ;;  %v3518_v58 = vld [vmem:[#allocation35_spill] sm:$0xff] }
 0x116   :  { %3494 = vst [vmem:[#allocation38_spill] sm:$0xff] %v2568_v29  ;;  %3497 = vst [vmem:[#allocation39_spill] sm:$0xff] %v2577_v54  ;;  %v529_v34 = vadd.f32 %v528_v22, %v2358_v7  ;;  %v642_v20 = vadd.f32 %v641_v52, %v2358_v7  ;;  %v3501_v4 = vmax.f32 %v2475_v55, 0.0  ;;  %v3502_v13 = vmax.f32 %v2483_v17, 0.0  ;;  %v3558_v29 = vld [vmem:[#allocation10_spill] sm:$0xff] }
 0x117   :  { %v883_v11 = vpack.c.bf16 %v3500_v19, %v3499_v36  ;;  %v530_v38 = vpop.f32.mrf.mxu0  ;;  %1063 = vmatpush1.bf16.msra.mxu0 %v890_v18  ;;  %v3503_v43 = vmax.f32 %v2422_v30, 0.0  ;;  %v3504_v27 = vmax.f32 %v2449_v44, 0.0  ;;  %v772_v16 = vmax.f32 %v2490_v21, 0.0  ;;  %v643_v23 = vpop.f32.mrf.mxu1  ;;  %1176 = vmatpush1.bf16.msra.mxu1 %v892_v49  ;;  %v3521_v36 = vld [vmem:[#allocation15_spill] sm:$0xff] }
 0x118   :  { %v885_v10 = vpack.c.bf16 %v3502_v13, %v3501_v4  ;;  %v726_v15 = vmax.f32 %v525_v46, 0.0  ;;  %v734_v28 = vmax.f32 %v529_v34, 0.0  ;;  %v531_v5 = vadd.f32 %v530_v38, %v2358_v7  ;;  %v3526_v4 = vld [vmem:[#allocation27_spill] sm:$0xff] }
 0x119   :  { %v875_v41 = vpack.c.bf16 %v3504_v27, %v3503_v43  ;;  %1064 = vmatprep.subr.bf16.mxu0 %v883_v11  ;;  %v3505_v35 = vmax.f32 %v2468_v37, 0.0  ;;  %v728_v39 = vmax.f32 %v638_v33, 0.0  ;;  %v736_v17 = vmax.f32 %v642_v20, 0.0  ;;  %v534_v30 = vpop.f32.mrf.mxu0  ;;  %v2605_v2 = vpop.f32.mrf.mxu1  ;;  %v3525_v20 = vld [vmem:[#allocation17_spill] sm:$0xff] }
 0x11a   :  { %v644_v61 = vadd.f32 %v643_v23, %v2358_v7  ;;  %1177 = vmatprep.subr.bf16.mxu1 %v885_v10  ;;  %v884_v44 = vpack.c.bf16 %v780_v0, %v772_v16  ;;  %v727_v60 = vmax.f32 %v527_v26, 0.0  ;;  %v2603_v40 = vpack.c.bf16 %v734_v28, %v726_v15  ;;  %3507 = vst [vmem:[#allocation41_spill] sm:$0xff] %v2605_v2  ;;  %v3519_v26 = vld [vmem:[#allocation34_spill] sm:$0xff]  ;;  %v3527_v10 = vld [vmem:[#allocation31_spill] sm:$0xff]  ;;  %v3530_v28 = vld [vmem:[#allocation25_spill] sm:$0xff] }
 0x11b   :  { %v882_v55 = vpack.c.bf16 %v778_v63, %v3505_v35  ;;  %v735_v21 = vmax.f32 %v531_v5, 0.0  ;;  %v729_v6 = vmax.f32 %v640_v53, 0.0  ;;  %v2607_v1 = vpack.c.bf16 %v736_v17, %v728_v39  ;;  %v2609_v51 = vpop.f32.mrf.mxu0  ;;  %v2620_v0 = vpop.f32.mrf.mxu1  ;;  %v3531_v23 = vld [vmem:[#allocation32_spill] sm:$0xff] }
 0x11c   :  { %3506 = vst [vmem:[#allocation40_spill] sm:$0xff] %v2603_v40  ;;  %v737_v57 = vmax.f32 %v644_v61, 0.0  ;;  %v3509_v37 = vmax.f32 %v2425_v32, 0.0  ;;  %v3510_v7 = vmax.f32 %v2457_v48, 0.0  ;;  %v739_v63 = vmax.f32 %v2440_v56, 0.0  ;;  %3512 = vst [vmem:[#allocation44_spill] sm:$0xff] %v2620_v0  ;;  %1178 = vmatpush1.bf16.msra.mxu1 %v884_v44 }
 0x11d   :  { %3508 = vst [vmem:[#allocation42_spill] sm:$0xff] %v2607_v1  ;;  %1065 = vmatpush1.bf16.msra.mxu0 %v882_v55  ;;  %v756_v24 = vmax.f32 %v2461_v50, 0.0  ;;  %v2617_v46 = vpack.c.bf16 %v735_v21, %v727_v60  ;;  %v535_v62 = vadd.f32 %v534_v30, %v2352_v3  ;;  %v741_v47 = vmax.f32 %v2443_v9, 0.0  ;;  %v3513_v32 = vld [vmem:[#allocation30_spill] sm:$0xff]  ;;  %v3515_v48 = vld [vmem:[#allocation33_spill] sm:$0xff]  ;;  %v538_v50 = vpop.f32.mrf.mxu0  ;;  %v2634_v11 = vpop.f32.mrf.mxu1  ;;  %v3523_v9 = vld [vmem:[#allocation28_spill] sm:$0xff] }
 0x11e   :  { %v877_v31 = vpack.c.bf16 %v3510_v7, %v3509_v37  ;;  %1066 = vmatprep.subr.bf16.mxu0 %v875_v41  ;;  %v746_v25 = vmax.f32 %v2446_v45, 0.0  ;;  %v3514_v18 = vmax.f32 %v3513_v32, 0.0  ;;  %v3516_v33 = vmax.f32 %v3515_v48, 0.0  ;;  %3522 = vst [vmem:[#allocation33_spill] sm:$0xff] %v2634_v11  ;;  %v3528_v41 = vld [vmem:[#allocation29_spill] sm:$0xff]  ;;  %v3533_v30 = vld [vmem:[#allocation26_spill] sm:$0xff] }
 0x11f   :  { %3511 = vst [vmem:[#allocation43_spill] sm:$0xff] %v2617_v46  ;;  %v2628_v56 = vpack.c.bf16 %v737_v57, %v729_v6  ;;  %v748_v49 = vmax.f32 %v3518_v58, 0.0  ;;  %v3520_v34 = vmax.f32 %v3519_v26, 0.0  ;;  %v539_v19 = vadd.f32 %v538_v50, %v3521_v36  ;;  %v2642_v27 = vpop.f32.mrf.mxu0  ;;  %v2648_v17 = vpop.f32.mrf.mxu1  ;;  %v3534_v6 = vld [vmem:[#allocation24_spill] sm:$0xff]  ;;  %v3559_v40 = vld [vmem:[#allocation7_spill] sm:$0xff]  ;;  %v3561_v46 = vld [vmem:[#allocation6_spill] sm:$0xff] }
 0x120   :  { %v874_v22 = vpack.c.bf16 %v3516_v33, %v3514_v18  ;;  %1179 = vmatprep.subr.bf16.mxu1 %v877_v31  ;;  %v3524_v45 = vmax.f32 %v3523_v9, 0.0  ;;  %v408_v38 = vadd.f32 %v3525_v20, %v2364_v12  ;;  %v733_v13 = vmax.f32 %v3526_v4, 0.0  ;;  %v3532_v12 = vld [vmem:[#allocation16_spill] sm:$0xff]  ;;  %v3538_v18 = vld [vmem:[#allocation23_spill] sm:$0xff] }
 0x121   :  { %3517 = vst [vmem:[#allocation30_spill] sm:$0xff] %v2628_v56  ;;  %v876_v52 = vpack.c.bf16 %v3520_v34, %v756_v24  ;;  %v738_v43 = vmax.f32 %v3527_v10, 0.0  ;;  %v3529_v16 = vmax.f32 %v3528_v41, 0.0  ;;  %v723_v5 = vmax.f32 %v3530_v28, 0.0  ;;  %v2653_v21 = vpop.f32.mrf.mxu0  ;;  %v2658_v31 = vpop.f32.mrf.mxu1  ;;  %v3539_v26 = vld [vmem:[#allocation20_spill] sm:$0xff] }
 0x122   :  { %v867_v53 = vpack.c.bf16 %v3524_v45, %v739_v63  ;;  %1067 = vmatpush1.bf16.msra.mxu0 %v874_v22  ;;  %v740_v35 = vmax.f32 %v3531_v23, 0.0  ;;  %v742_v55 = vmax.f32 %v535_v62, 0.0  ;;  %v750_v39 = vmax.f32 %v539_v19, 0.0  ;;  %v3536_v63 = vld [vmem:[#allocation22_spill] sm:$0xff]  ;;  %v3540_v19 = vld [vmem:[#allocation21_spill] sm:$0xff]  ;;  %v3560_v56 = vld [vmem:[#allocation8_spill] sm:$0xff] }
 0x123   :  { %v869_v15 = vpack.c.bf16 %v3529_v16, %v741_v47  ;;  %1180 = vmatpush1.bf16.msra.mxu1 %v876_v52  ;;  %v404_v61 = vadd.f32 %v3532_v12, %v2360_v8  ;;  %v725_v44 = vmax.f32 %v3533_v30, 0.0  ;;  %v866_v60 = vpack.c.bf16 %v746_v25, %v738_v43  ;;  %v2662_v32 = vpop.f32.mrf.mxu0  ;;  %v2665_v48 = vpop.f32.mrf.mxu1  ;;  %v2699_v23 = vld [vmem:[%s3386_s3 + $0x8] sm:$0xff]  }
 0x124   :  { %1068 = vmatprep.subr.bf16.mxu0 %v867_v53  ;;  %v715_v57 = vmax.f32 %v3534_v6, 0.0  ;;  %v868_v37 = vpack.c.bf16 %v748_v49, %v740_v35  ;;  %v2656_v7 = vpack.c.bf16 %v750_v39, %v742_v55  ;;  %v3537_v24 = vmax.f32 %v3536_v63, 0.0  ;;  %v2680_v53 = vld [vmem:[%s3386_s3] sm:$0xff]   ;;  %3545 = vst [vmem:[#allocation28_spill] sm:$0xff] %v2699_v23  ;;  %v2712_v6 = vld [vmem:[%s3386_s3 + $0x10] sm:$0xff]  }
 0x125   :  { %1181 = vmatprep.subr.bf16.mxu1 %v869_v15  ;;  %v717_v47 = vmax.f32 %v408_v38, 0.0  ;;  %v861_v8 = vpack.c.bf16 %v733_v13, %v725_v44  ;;  %v707_v25 = vmax.f32 %v3538_v18, 0.0  ;;  %v709_v33 = vmax.f32 %v404_v61, 0.0  ;;  %v2667_v22 = vpop.f32.mrf.mxu0  ;;  %v2669_v50 = vpop.f32.mrf.mxu1  ;;  %3541 = vst [vmem:[#allocation34_spill] sm:$0xff] %v2680_v53  ;;  %v3542_v38 = vld [vmem:[#allocation18_spill] sm:$0xff]  ;;  %v3543_v13 = vld [vmem:[#allocation19_spill] sm:$0xff] }
 0x126   :  { %3535 = vst [vmem:[#allocation35_spill] sm:$0xff] %v2656_v7  ;;  %v859_v62 = vpack.c.bf16 %v3537_v24, %v723_v5  ;;  %1069 = vmatpush1.bf16.msra.mxu0 %v866_v60  ;;  %v3544_v16 = vmov 0   ;;  %3546 = vst [vmem:[#allocation17_spill] sm:$0xff] %v2712_v6  ;;  %v2720_v18 = vadd.f32 %v2609_v51, %v2352_v3 }
 0x127   :  { %1182 = vmatpush1.bf16.msra.mxu1 %v868_v37  ;;  %v851_v58 = vpack.c.bf16 %v715_v57, %v707_v25  ;;  %v550_v49 = vpop.f32.mrf.mxu0  ;;  %v853_v34 = vpack.c.bf16 %v717_v47, %v709_v33  ;;  %v663_v52 = vpop.f32.mrf.mxu1  ;;  %v2724_v25 = vadd.f32 %v2642_v27, %v3521_v36  ;;  %v2728_v33 = vadd.f32 %v2648_v17, %v3521_v36  ;;  %v3554_v27 = vld [vmem:[#allocation14_spill] sm:$0xff] }
 0x128   :  { %1070 = vmatprep.subr.bf16.mxu0 %v859_v62  ;;  %1183 = vmatprep.subr.bf16.mxu1 %v861_v8  ;;  %3547 = vst [vmem:[#allocation27_spill] sm:$0xff] %v2720_v18  ;;  %v2747_v17 = vadd.f32 %v663_v52, %v3554_v27 }
 0x129   :  { %v2673_v9 = vpop.f32.mrf.mxu0  ;;  %v2675_v45 = vpop.f32.mrf.mxu1  ;;  %3548 = vst [vmem:[#allocation31_spill] sm:$0xff] %v2724_v25  ;;  %3549 = vst [vmem:[#allocation29_spill] sm:$0xff] %v2728_v33 }
 0x12a   :  { %1071 = vmatpush1.bf16.msra.mxu0 %v3539_v26 }
 0x12b   :  { %1184 = vmatpush1.bf16.msra.mxu1 %v3540_v19  ;;  %1072 = vmatprep.subr.bf16.mxu0 %v851_v58  ;;  %v556_v20 = vpop.f32.mrf.mxu0  ;;  %v669_v4 = vpop.f32.mrf.mxu1  ;;  %v3550_v58 = vld [vmem:[#allocation13_spill] sm:$0xff]  ;;  %v2737_v19 = vld [vmem:[%s3386_s3 + $0x18] sm:$0xff]  }
 0x12c   :  { %1185 = vmatprep.subr.bf16.mxu1 %v853_v34  ;;  %v2732_v26 = vadd.f32 %v2662_v32, %v3550_v58  ;;  %3552 = vst [vmem:[#allocation32_spill] sm:$0xff] %v2737_v19  ;;  %v2741_v51 = vadd.f32 %v2665_v48, %v3550_v58  ;;  %v3557_v48 = vld [vmem:[#allocation9_spill] sm:$0xff] }
 0x12d   :  { %v2684_v10 = vpop.f32.mrf.mxu0  ;;  %v2686_v43 = vpop.f32.mrf.mxu1 }
 0x12e   :  { %1073 = vmatpush1.bf16.msra.mxu0 %v3542_v38  ;;  %3551 = vst [vmem:[#allocation25_spill] sm:$0xff] %v2732_v26  ;;  %3553 = vst [vmem:[#allocation16_spill] sm:$0xff] %v2741_v51  ;;  %v2744_v38 = vadd.f32 %v550_v49, %v3554_v27 }
 0x12f   :  { %1186 = vmatpush1.bf16.msra.mxu1 %v3543_v13  ;;  %v560_v41 = vpop.f32.mrf.mxu0  ;;  %v673_v15 = vpop.f32.mrf.mxu1  ;;  %v3555_v13 = vld [vmem:[#allocation11_spill] sm:$0xff] }
 0x131   :  { %1091 = vmatmul.mubr.bf16.vlgmr.msra.gmra.mxu0 %v2680_v53  ;;  %v2692_v28 = vpop.f32.mrf.mxu0  ;;  %v2694_v5 = vpop.f32.mrf.mxu1 }
 0x132   :  { %1204 = vmatmul.mubr.bf16.vlgmr.msra.gmra.mxu1 %v2680_v53  ;;  %1100 = vmatprep.mubr.bf16.mxu0 %v3544_v16  ;;  %v3556_v53 = vld [vmem:[#allocation12_spill] sm:$0xff] }
 0x133   :  { %1213 = vmatprep.mubr.bf16.mxu1 %v3544_v16  ;;  %v566_v35 = vpop.f32.mrf.mxu0  ;;  %v679_v55 = vpop.f32.mrf.mxu1  ;;  %v2756_v14 = vadd.f32 %v560_v41, %v3556_v53  ;;  %v2759_v42 = vadd.f32 %v673_v15, %v3556_v53 }
 0x134   :  { %v2762_v54 = vadd.f32 %v566_v35, %v3557_v48  ;;  %v2765_v52 = vadd.f32 %v679_v55, %v3557_v48 }
 0x135   :  { %v568_v39 = vpop.f32.mrf.mxu0  ;;  %v2701_v12 = vpop.f32.mrf.mxu1 }
 0x137   :  { %v570_v61 = vpop.f32.mrf.mxu0  ;;  %v683_v30 = vpop.f32.mrf.mxu1 }
 0x138   :  { %v2771_v1 = vadd.f32 %v570_v61, %v3558_v29 }
 0x139   :  { %1101 = vmatmul.mubr.bf16.gmra.mxu0 %v2699_v23  ;;  %v574_v44 = vpop.f32.mrf.mxu0  ;;  %v2707_v60 = vpop.f32.mrf.mxu1 }
 0x13a   :  { %1214 = vmatmul.mubr.bf16.gmra.mxu1 %v2699_v23  ;;  %1110 = vmatprep.mubr.bf16.mxu0 %v3544_v16  ;;  %v2753_v23 = vadd.f32 %v669_v4, %v3555_v13  ;;  %v2774_v4 = vadd.f32 %v683_v30, %v3558_v29  ;;  %v2777_v15 = vadd.f32 %v574_v44, %v3559_v40 }
 0x13b   :  { %1223 = vmatprep.mubr.bf16.mxu1 %v3544_v16  ;;  %v576_v57 = vpop.f32.mrf.mxu0  ;;  %v689_v37 = vpop.f32.mrf.mxu1 }
 0x13c   :  { %v577_v44 = vadd.f32 %v576_v57, %v3559_v40 }
 0x13d   :  { %v578_v63 = vpop.f32.mrf.mxu0  ;;  %v691_v24 = vpop.f32.mrf.mxu1 }
 0x13f   :  { %v580_v62 = vpop.f32.mrf.mxu0  ;;  %v693_v47 = vpop.f32.mrf.mxu1 }
 0x140   :  { %v581_v35 = vadd.f32 %v580_v62, %v3560_v56 }
 0x141   :  { %1111 = vmatmul.mubr.bf16.gmra.mxu0 %v2712_v6  ;;  %v584_v8 = vpop.f32.mrf.mxu0  ;;  %v697_v34 = vpop.f32.mrf.mxu1 }
 0x142   :  { %1224 = vmatmul.mubr.bf16.gmra.mxu1 %v2712_v6  ;;  %1120 = vmatprep.mubr.bf16.mxu0 %v3544_v16  ;;  %v2750_v6 = vadd.f32 %v556_v20, %v3555_v13  ;;  %v2768_v20 = vadd.f32 %v568_v39, %v3558_v29  ;;  %v694_v39 = vadd.f32 %v693_v47, %v3560_v56 }
 0x143   :  { %1233 = vmatprep.mubr.bf16.mxu1 %v3544_v16  ;;  %v586_v32 = vpop.f32.mrf.mxu0  ;;  %v699_v49 = vpop.f32.mrf.mxu1  ;;  %v585_v62 = vadd.f32 %v584_v8, %v3561_v46  ;;  %v690_v47 = vadd.f32 %v689_v37, %v3559_v40  ;;  %v688_v37 = vadd.f32 %v2707_v60, %v3559_v40  ;;  %v801_v40 = vmax.f32 %v2774_v4, 0.0 }
 0x144   :  { %v587_v7 = vadd.f32 %v586_v32, %v3561_v46  ;;  %v700_v61 = vadd.f32 %v699_v49, %v3561_v46  ;;  %v698_v32 = vadd.f32 %v697_v34, %v3561_v46  ;;  %v692_v49 = vadd.f32 %v691_v24, %v3560_v56  ;;  %v2800_v46 = vld [vmem:[%s3386_s3 + $0x20] sm:$0xff]  }
 0x145   :  { %v588_v41 = vpop.f32.mrf.mxu0  ;;  %v701_v18 = vpop.f32.mrf.mxu1  ;;  %v817_v8 = vmax.f32 %v694_v39, 0.0  ;;  %v793_v4 = vmax.f32 %v2765_v52, 0.0  ;;  %v668_v52 = vadd.f32 %v2675_v45, %v3555_v13 }
 0x146   :  { %v589_v55 = vadd.f32 %v588_v41, %v2336_v59  ;;  %v702_v30 = vadd.f32 %v701_v18, %v2336_v59  ;;  %v579_v18 = vadd.f32 %v578_v63, %v3560_v56  ;;  %v823_v25 = vmax.f32 %v587_v7, 0.0 }
 0x147   :  { %v590_v2 = vpop.f32.mrf.mxu0  ;;  %v703_v33 = vpop.f32.mrf.mxu1  ;;  %v825_v34 = vmax.f32 %v700_v61, 0.0  ;;  %v822_v63 = vmax.f32 %v585_v62, 0.0  ;;  %v824_v56 = vmax.f32 %v698_v32, 0.0  ;;  %v807_v7 = vmax.f32 %v577_v44, 0.0 }
 0x148   :  { %v591_v41 = vadd.f32 %v590_v2, %v2336_v59  ;;  %v830_v51 = vmax.f32 %v589_v55, 0.0  ;;  %v832_v57 = vmax.f32 %v702_v30, 0.0  ;;  %v815_v2 = vmax.f32 %v581_v35, 0.0 }
 0x149   :  { %1121 = vmatmul.mubr.bf16.gmra.mxu0 %v2737_v19  ;;  %v814_v30 = vmax.f32 %v579_v18, 0.0  ;;  %v549_v61 = vadd.f32 %v2667_v22, %v3554_v27  ;;  %v777_v44 = vmax.f32 %v2753_v23, 0.0  ;;  %v658_v23 = vadd.f32 %v2658_v31, %v3550_v58 }
 0x14a   :  { %1234 = vmatmul.mubr.bf16.gmra.mxu1 %v2737_v19  ;;  %1130 = vmatprep.mubr.bf16.mxu0 %v3544_v16  ;;  %v704_v19 = vadd.f32 %v703_v33, %v2336_v59  ;;  %v831_v26 = vmax.f32 %v591_v41, 0.0  ;;  %v682_v59 = vadd.f32 %v2701_v12, %v3558_v29  ;;  %v809_v33 = vmax.f32 %v690_v47, 0.0 }
 0x14b   :  { %1243 = vmatprep.mubr.bf16.mxu1 %v3544_v16  ;;  %v816_v41 = vmax.f32 %v692_v49, 0.0  ;;  %v910_v36 = vpack.c.bf16 %v830_v51, %v822_v63  ;;  %v912_v0 = vpack.c.bf16 %v832_v57, %v824_v56  ;;  %v903_v60 = vpack.c.bf16 %v815_v2, %v807_v7  ;;  %v3564_v57 = vld [vmem:[#allocation33_spill] sm:$0xff] }
 0x14c   :  { %v833_v11 = vmax.f32 %v704_v19, 0.0  ;;  %v911_v24 = vpack.c.bf16 %v831_v26, %v823_v25  ;;  %v799_v19 = vmax.f32 %v2771_v1, 0.0  ;;  %v905_v35 = vpack.c.bf16 %v817_v8, %v809_v33  ;;  %v3565_v8 = vld [vmem:[#allocation25_spill] sm:$0xff] }
 0x14d   :  { %v565_v29 = vadd.f32 %v2692_v28, %v3557_v48  ;;  %v806_v12 = vmax.f32 %v2777_v15, 0.0  ;;  %v808_v25 = vmax.f32 %v688_v37, 0.0  ;;  %v559_v1 = vadd.f32 %v2684_v10, %v3556_v53  ;;  %v3566_v37 = vld [vmem:[#allocation16_spill] sm:$0xff]  ;;  %v3568_v33 = vld [vmem:[#allocation29_spill] sm:$0xff] }
 0x14e   :  { %v913_v55 = vpack.c.bf16 %v833_v11, %v825_v34  ;;  %1284 = vmatprep.subr.bf16.mxu0 %v911_v24  ;;  %v678_v11 = vadd.f32 %v2694_v5, %v3557_v48  ;;  %v672_v26 = vadd.f32 %v2686_v43, %v3556_v53  ;;  %v791_v51 = vmax.f32 %v2762_v54, 0.0 }
 0x14f   :  { %1285 = vmatpush1.bf16.msra.mxu0 %v910_v36  ;;  %v798_v28 = vmax.f32 %v2768_v20, 0.0  ;;  %v800_v5 = vmax.f32 %v682_v59, 0.0  ;;  %v902_v48 = vpack.c.bf16 %v814_v30, %v806_v12  ;;  %v904_v15 = vpack.c.bf16 %v816_v41, %v808_v25  ;;  %v3567_v59 = vld [vmem:[#allocation31_spill] sm:$0xff] }
 0x150   :  { %1397 = vmatprep.subr.bf16.mxu1 %v913_v55  ;;  %1286 = vmatprep.subr.bf16.mxu0 %v903_v60  ;;  %v783_v54 = vmax.f32 %v2756_v14, 0.0  ;;  %v785_v36 = vmax.f32 %v2759_v42, 0.0  ;;  %v895_v53 = vpack.c.bf16 %v799_v19, %v791_v51  ;;  %v897_v10 = vpack.c.bf16 %v801_v40, %v793_v4  ;;  %v3569_v19 = vld [vmem:[#allocation41_spill] sm:$0xff] }
 0x151   :  { %1131 = vmatmul.mubr.bf16.gmra.mxu0 %v2800_v46  ;;  %1398 = vmatpush1.bf16.msra.mxu1 %v912_v0  ;;  %v2827_v0 = vld [vmem:[%s3386_s3 + $0x28] sm:$0xff]   ;;  %v555_v43 = vadd.f32 %v2673_v9, %v3555_v13  ;;  %v790_v20 = vmax.f32 %v565_v29, 0.0  ;;  %v792_v39 = vmax.f32 %v678_v11, 0.0  ;;  %v662_v14 = vadd.f32 %v2669_v50, %v3554_v27  ;;  %v3570_v29 = vld [vmem:[#allocation27_spill] sm:$0xff] }
 0x152   :  { %1244 = vmatmul.mubr.bf16.gmra.mxu1 %v2800_v46  ;;  %1399 = vmatprep.subr.bf16.mxu1 %v905_v35  ;;  %v775_v42 = vmax.f32 %v2750_v6, 0.0  ;;  %v782_v9 = vmax.f32 %v559_v1, 0.0  ;;  %v784_v62 = vmax.f32 %v672_v26, 0.0  ;;  %v767_v13 = vmax.f32 %v2744_v38, 0.0  ;;  %v3562_v38 = vld [vmem:[#allocation44_spill] sm:$0xff] }
 0x153   :  { %1140 = vmatprep.mubr.bf16.mxu0 %v3544_v16  ;;  %1253 = vmatprep.mubr.bf16.mxu1 %v3544_v16  ;;  %v894_v32 = vpack.c.bf16 %v798_v28, %v790_v20  ;;  %v896_v45 = vpack.c.bf16 %v800_v5, %v792_v39  ;;  %v769_v47 = vmax.f32 %v2747_v17, 0.0  ;;  %v889_v18 = vpack.c.bf16 %v785_v36, %v777_v44  ;;  %v3563_v17 = vld [vmem:[#allocation15_spill] sm:$0xff]  ;;  %v2018_v5 = vld [vmem:[%s3386_s3 + $0x38] sm:$0xff]   ;;  %v3579_v20 = vld [vmem:[#allocation37_spill] sm:$0xff] }
 0x154   :  { %1287 = vmatpush1.bf16.msra.mxu0 %v902_v48  ;;  %v887_v22 = vpack.c.bf16 %v783_v54, %v775_v42  ;;  %v545_v50 = vadd.f32 %v2653_v21, %v3550_v58  ;;  %v774_v6 = vmax.f32 %v555_v43, 0.0  ;;  %v776_v27 = vmax.f32 %v668_v52, 0.0  ;;  %v2860_v58 = vld [vmem:[%s3386_s3 + $0x30] sm:$0xff]   ;;  %v3573_v54 = vld [vmem:[#allocation30_spill] sm:$0xff]  ;;  %v3574_v36 = vld [vmem:[#allocation40_spill] sm:$0xff] }
 0x155   :  { %1400 = vmatpush1.bf16.msra.mxu1 %v904_v15  ;;  %1288 = vmatprep.subr.bf16.mxu0 %v895_v53  ;;  %v650_v49 = vadd.f32 %v3562_v38, %v2352_v3  ;;  %v652_v2 = vadd.f32 %v3564_v57, %v3563_v17  ;;  %v759_v34 = vmax.f32 %v3565_v8, 0.0  ;;  %v761_v63 = vmax.f32 %v3566_v37, 0.0  ;;  %v3571_v48 = vld [vmem:[#allocation35_spill] sm:$0xff]  ;;  %v3575_v53 = vld [vmem:[#allocation42_spill] sm:$0xff]  ;;  %v3578_v52 = vld [vmem:[#allocation36_spill] sm:$0xff] }
 0x156   :  { %1401 = vmatprep.subr.bf16.mxu1 %v897_v10  ;;  %v766_v21 = vmax.f32 %v549_v61, 0.0  ;;  %v768_v56 = vmax.f32 %v662_v14, 0.0  ;;  %v886_v24 = vpack.c.bf16 %v782_v9, %v774_v6  ;;  %v888_v31 = vpack.c.bf16 %v784_v62, %v776_v27  ;;  %v3572_v15 = vld [vmem:[#allocation43_spill] sm:$0xff]  ;;  %v3576_v10 = vld [vmem:[#allocation38_spill] sm:$0xff]  ;;  %v3581_v61 = vld [vmem:[#allocation28_spill] sm:$0xff] }
 0x157   :  { %v751_v7 = vmax.f32 %v3567_v59, 0.0  ;;  %v753_v55 = vmax.f32 %v3568_v33, 0.0  ;;  %v879_v30 = vpack.c.bf16 %v767_v13, %v759_v34  ;;  %v881_v41 = vpack.c.bf16 %v769_v47, %v761_v63  ;;  %v3577_v43 = vld [vmem:[#allocation39_spill] sm:$0xff]  ;;  %v3580_v39 = vld [vmem:[#allocation34_spill] sm:$0xff]  ;;  %v3582_v14 = vld [vmem:[#allocation17_spill] sm:$0xff] }
 0x158   :  { %1289 = vmatpush1.bf16.msra.mxu0 %v894_v32  ;;  %v648_v40 = vadd.f32 %v3569_v19, %v2352_v3  ;;  %v758_v60 = vmax.f32 %v545_v50, 0.0  ;;  %v760_v35 = vmax.f32 %v658_v23, 0.0  ;;  %v743_v11 = vmax.f32 %v3570_v29, 0.0  ;;  %v3583_v42 = vld [vmem:[#allocation32_spill] sm:$0xff] }
 0x159   :  { %1141 = vmatmul.mubr.bf16.gmra.mxu0 %v2827_v0  ;;  %1402 = vmatpush1.bf16.msra.mxu1 %v896_v45  ;;  %v745_v12 = vmax.f32 %v650_v49, 0.0  ;;  %v752_v25 = vmax.f32 %v652_v2, 0.0 }
 0x15a   :  { %1254 = vmatmul.mubr.bf16.gmra.mxu1 %v2827_v0  ;;  %1150 = vmatprep.mubr.bf16.mxu0 %v3544_v16  ;;  %v878_v1 = vpack.c.bf16 %v766_v21, %v758_v60  ;;  %v880_v26 = vpack.c.bf16 %v768_v56, %v760_v35  ;;  %v871_v51 = vpack.c.bf16 %v751_v7, %v743_v11  ;;  %v744_v3 = vmax.f32 %v648_v40, 0.0 }
 0x15b   :  { %1290 = vmatprep.subr.bf16.mxu0 %v887_v22  ;;  %1403 = vmatprep.subr.bf16.mxu1 %v889_v18  ;;  %v873_v4 = vpack.c.bf16 %v753_v55, %v745_v12 }
 0x15c   :  { %1263 = vmatprep.mubr.bf16.mxu1 %v3544_v16  ;;  %1291 = vmatpush1.bf16.msra.mxu0 %v886_v24  ;;  %v872_v28 = vpack.c.bf16 %v752_v25, %v744_v3 }
 0x15d   :  { %1404 = vmatpush1.bf16.msra.mxu1 %v888_v31  ;;  %1292 = vmatprep.subr.bf16.mxu0 %v879_v30 }
 0x15e   :  { %1405 = vmatprep.subr.bf16.mxu1 %v881_v41 }
 0x160   :  { %1293 = vmatpush1.bf16.msra.mxu0 %v878_v1 }
 0x161   :  { %1151 = vmatmul.mubr.bf16.gmra.mxu0 %v2860_v58  ;;  %1406 = vmatpush1.bf16.msra.mxu1 %v880_v26 }
 0x162   :  { %1264 = vmatmul.mubr.bf16.gmra.mxu1 %v2860_v58  ;;  %1160 = vmatprep.mubr.bf16.mxu0 %v3544_v16 }
 0x163   :  { %1294 = vmatprep.subr.bf16.mxu0 %v871_v51  ;;  %1407 = vmatprep.subr.bf16.mxu1 %v873_v4 }
 0x164   :  { %1273 = vmatprep.mubr.bf16.mxu1 %v3544_v16  ;;  %1295 = vmatpush1.bf16.msra.mxu0 %v3571_v48 }
 0x165   :  { %1408 = vmatpush1.bf16.msra.mxu1 %v872_v28  ;;  %1296 = vmatprep.subr.bf16.mxu0 %v3572_v15 }
 0x166   :  { %1409 = vmatprep.subr.bf16.mxu1 %v3573_v54 }
 0x168   :  { %1297 = vmatpush1.bf16.msra.mxu0 %v3574_v36 }
 0x169   :  { %1161 = vmatmul.mubr.bf16.gmra.mxu0 %v2018_v5  ;;  %1410 = vmatpush1.bf16.msra.mxu1 %v3575_v53 }
 0x16a   :  { %1274 = vmatmul.mubr.bf16.gmra.mxu1 %v2018_v5  ;;  %1316 = vmatprep.mubr.bf16.mxu0 %v3544_v16 }
 0x16b   :  { %1298 = vmatprep.subr.bf16.mxu0 %v3576_v10  ;;  %1411 = vmatprep.subr.bf16.mxu1 %v3577_v43 }
 0x16c   :  { %1429 = vmatprep.mubr.bf16.mxu1 %v3544_v16  ;;  %1299 = vmatpush1.bf16.msra.mxu0 %v3578_v52 }
 0x16d   :  { %1412 = vmatpush1.bf16.msra.mxu1 %v3579_v20 }
 0x171   :  { %1317 = vmatmul.mubr.bf16.vlgmr.msra.gmra.mxu0 %v3580_v39 }
 0x172   :  { %1430 = vmatmul.mubr.bf16.vlgmr.msra.gmra.mxu1 %v3580_v39  ;;  %1326 = vmatprep.mubr.bf16.mxu0 %v3544_v16 }
 0x173   :  { %1439 = vmatprep.mubr.bf16.mxu1 %v3544_v16 }
 0x179   :  { %1327 = vmatmul.mubr.bf16.gmra.mxu0 %v3581_v61 }
 0x17a   :  { %1440 = vmatmul.mubr.bf16.gmra.mxu1 %v3581_v61  ;;  %1336 = vmatprep.mubr.bf16.mxu0 %v3544_v16 }
 0x17b   :  { %1449 = vmatprep.mubr.bf16.mxu1 %v3544_v16 }
 0x181   :  { %1337 = vmatmul.mubr.bf16.gmra.mxu0 %v3582_v14 }
 0x182   :  { %1450 = vmatmul.mubr.bf16.gmra.mxu1 %v3582_v14  ;;  %1346 = vmatprep.mubr.bf16.mxu0 %v3544_v16 }
 0x183   :  { %1459 = vmatprep.mubr.bf16.mxu1 %v3544_v16 }
 0x189   :  { %1347 = vmatmul.mubr.bf16.gmra.mxu0 %v3583_v42 }
 0x18a   :  { %1460 = vmatmul.mubr.bf16.gmra.mxu1 %v3583_v42  ;;  %1356 = vmatprep.mubr.bf16.mxu0 %v3544_v16 }
 0x18b   :  { %1469 = vmatprep.mubr.bf16.mxu1 %v3544_v16 }
 0x191   :  { %1357 = vmatmul.mubr.bf16.gmra.mxu0 %v2800_v46 }
 0x192   :  { %1470 = vmatmul.mubr.bf16.gmra.mxu1 %v2800_v46  ;;  %1366 = vmatprep.mubr.bf16.mxu0 %v3544_v16  ;;  %v2915_v46 = vpop.permute.xlu0 %1002 }
 0x193   :  { %1479 = vmatprep.mubr.bf16.mxu1 %v3544_v16  ;;  %3584 = vst [vmem:[#allocation26_spill] sm:$0xff] %v2915_v46 }
 0x196   :  { %v2919_v44 = vpop.permute.xlu0 %992 }
 0x197   :  { %3586 = vst [vmem:[#allocation22_spill] sm:$0xff] %v2919_v44 }
 0x199   :  { %1367 = vmatmul.mubr.bf16.gmra.mxu0 %v2827_v0 }
 0x19a   :  { %1480 = vmatmul.mubr.bf16.gmra.mxu1 %v2827_v0  ;;  %1376 = vmatprep.mubr.bf16.mxu0 %v3544_v16  ;;  %v2917_v0 = vpop.permute.xlu1 %1007  ;;  %v2923_v62 = vpop.permute.xlu0 %982 }
 0x19b   :  { %1489 = vmatprep.mubr.bf16.mxu1 %v3544_v16  ;;  %3585 = vst [vmem:[#allocation24_spill] sm:$0xff] %v2917_v0  ;;  %3588 = vst [vmem:[#allocation20_spill] sm:$0xff] %v2923_v62 }
 0x19e   :  { %v2921_v9 = vpop.permute.xlu1 %997  ;;  %v2927_v45 = vpop.permute.xlu0 %972 }
 0x19f   :  { %3587 = vst [vmem:[#allocation23_spill] sm:$0xff] %v2921_v9  ;;  %3590 = vst [vmem:[#allocation18_spill] sm:$0xff] %v2927_v45 }
 0x1a1   :  { %1377 = vmatmul.mubr.bf16.gmra.mxu0 %v2860_v58 }
 0x1a2   :  { %1490 = vmatmul.mubr.bf16.gmra.mxu1 %v2860_v58  ;;  %1386 = vmatprep.mubr.bf16.mxu0 %v3544_v16  ;;  %v2925_v32 = vpop.permute.xlu1 %987  ;;  %v2931_v47 = vpop.permute.xlu0 %962 }
 0x1a3   :  { %1499 = vmatprep.mubr.bf16.mxu1 %v3544_v16  ;;  %3589 = vst [vmem:[#allocation21_spill] sm:$0xff] %v2925_v32  ;;  %3592 = vst [vmem:[#allocation13_spill] sm:$0xff] %v2931_v47 }
 0x1a6   :  { %v2929_v13 = vpop.permute.xlu1 %977  ;;  %v2935_v18 = vpop.permute.xlu0 %952 }
 0x1a7   :  { %3591 = vst [vmem:[#allocation19_spill] sm:$0xff] %v2929_v13  ;;  %3594 = vst [vmem:[#allocation11_spill] sm:$0xff] %v2935_v18 }
 0x1a9   :  { %1387 = vmatmul.mubr.bf16.gmra.mxu0 %v2018_v5 }
 0x1aa   :  { %1500 = vmatmul.mubr.bf16.gmra.mxu1 %v2018_v5  ;;  %1737 = vmatprep.mubr.bf16.mxu0 %v3544_v16  ;;  %v2933_v22 = vpop.permute.xlu1 %967  ;;  %v2939_v23 = vpop.permute.xlu0 %942 }
 0x1ab   :  { %1778 = vmatprep.mubr.bf16.mxu1 %v3544_v16  ;;  %3593 = vst [vmem:[#allocation14_spill] sm:$0xff] %v2933_v22 }
 0x1ae   :  { %v2937_v50 = vpop.permute.xlu1 %957  ;;  %v2943_v49 = vpop.permute.xlu0 %932 }
 0x1af   :  { %3595 = vst [vmem:[#allocation12_spill] sm:$0xff] %v2937_v50 }
 0x1b2   :  { %v2941_v6 = vpop.permute.xlu1 %947 }
 0x1b6   :  { %v2946_v8 = vpop.permute.xlu1 %937 }
 0x1f1   :  { %v1092_v27 = vpop.f32.mrf.mxu0 }
 0x1f2   :  { %v1205_v38 = vpop.f32.mrf.mxu1  ;;  %v1093_v57 = vadd.f32 %v1092_v27, %v2943_v49 }
 0x1f3   :  { %v1094_v17 = vpop.f32.mrf.mxu0  ;;  %v1206_v34 = vadd.f32 %v1205_v38, %v2943_v49 }
 0x1f4   :  { %v1207_v2 = vpop.f32.mrf.mxu1  ;;  %v1095_v63 = vadd.f32 %v1094_v17, %v2943_v49  ;;  %v1510_v59 = vmax.f32 %v1093_v57, 0.0 }
 0x1f5   :  { %v1096_v37 = vpop.f32.mrf.mxu0  ;;  %v1208_v24 = vadd.f32 %v1207_v2, %v2943_v49  ;;  %v1512_v30 = vmax.f32 %v1206_v34, 0.0 }
 0x1f6   :  { %v1097_v21 = vadd.f32 %v1096_v37, %v2946_v8  ;;  %v1209_v56 = vpop.f32.mrf.mxu1  ;;  %v1511_v60 = vmax.f32 %v1095_v63, 0.0 }
 0x1f7   :  { %v1210_v31 = vadd.f32 %v1209_v56, %v2946_v8  ;;  %v1098_v58 = vpop.f32.mrf.mxu0  ;;  %v1513_v12 = vmax.f32 %v1208_v24, 0.0 }
 0x1f8   :  { %v1518_v7 = vmax.f32 %v1097_v21, 0.0  ;;  %v1099_v33 = vadd.f32 %v1098_v58, %v2946_v8  ;;  %v1211_v55 = vpop.f32.mrf.mxu1 }
 0x1f9   :  { %v1520_v41 = vmax.f32 %v1210_v31, 0.0  ;;  %v1212_v19 = vadd.f32 %v1211_v55, %v2946_v8  ;;  %v1102_v40 = vpop.f32.mrf.mxu0 }
 0x1fa   :  { %v2955_v35 = vpack.c.bf16 %v1518_v7, %v1510_v59  ;;  %v1519_v29 = vmax.f32 %v1099_v33, 0.0  ;;  %v1215_v11 = vpop.f32.mrf.mxu1  ;;  %v1103_v4 = vadd.f32 %v1102_v40, %v2939_v23 }
 0x1fb   :  { %v2957_v25 = vpack.c.bf16 %v1520_v41, %v1512_v30  ;;  %v1521_v1 = vmax.f32 %v1212_v19, 0.0  ;;  %v1104_v26 = vpop.f32.mrf.mxu0  ;;  %v1216_v5 = vadd.f32 %v1215_v11, %v2939_v23 }
 0x1fc   :  { %3596 = vst [vmem:[#allocation9_spill] sm:$0xff] %v2955_v35  ;;  %v2959_v51 = vpack.c.bf16 %v1519_v29, %v1511_v60  ;;  %v1217_v3 = vpop.f32.mrf.mxu1  ;;  %v1105_v15 = vadd.f32 %v1104_v26, %v2939_v23  ;;  %v1526_v52 = vmax.f32 %v1103_v4, 0.0 }
 0x1fd   :  { %3597 = vst [vmem:[#allocation10_spill] sm:$0xff] %v2957_v25  ;;  %v2962_v28 = vpack.c.bf16 %v1521_v1, %v1513_v12  ;;  %v1106_v48 = vpop.f32.mrf.mxu0  ;;  %v1218_v53 = vadd.f32 %v1217_v3, %v2939_v23  ;;  %v1528_v14 = vmax.f32 %v1216_v5, 0.0 }
 0x1fe   :  { %3598 = vst [vmem:[#allocation7_spill] sm:$0xff] %v2959_v51  ;;  %v1107_v54 = vadd.f32 %v1106_v48, %v2941_v6  ;;  %v1219_v36 = vpop.f32.mrf.mxu1  ;;  %v1527_v17 = vmax.f32 %v1105_v15, 0.0 }
 0x1ff   :  { %3599 = vst [vmem:[#allocation8_spill] sm:$0xff] %v2962_v28  ;;  %v1220_v10 = vadd.f32 %v1219_v36, %v2941_v6  ;;  %v1108_v43 = vpop.f32.mrf.mxu0  ;;  %v1529_v37 = vmax.f32 %v1218_v53, 0.0 }
 0x200   :  { %v1534_v20 = vmax.f32 %v1107_v54, 0.0  ;;  %v1109_v39 = vadd.f32 %v1108_v43, %v2941_v6  ;;  %v1221_v61 = vpop.f32.mrf.mxu1 }
 0x201   :  { %v1536_v42 = vmax.f32 %v1220_v10, 0.0  ;;  %v1222_v27 = vadd.f32 %v1221_v61, %v2941_v6  ;;  %v1112_v38 = vpop.f32.mrf.mxu0 }
 0x202   :  { %v2971_v57 = vpack.c.bf16 %v1534_v20, %v1526_v52  ;;  %v1535_v2 = vmax.f32 %v1109_v39, 0.0  ;;  %v2973_v34 = vpop.f32.mrf.mxu1 }
 0x203   :  { %v2975_v63 = vpack.c.bf16 %v1536_v42, %v1528_v14  ;;  %v1537_v21 = vmax.f32 %v1222_v27, 0.0  ;;  %v1114_v56 = vpop.f32.mrf.mxu0 }
 0x204   :  { %3600 = vst [vmem:[#allocation6_spill] sm:$0xff] %v2971_v57  ;;  %v2977_v24 = vpack.c.bf16 %v1535_v2, %v1527_v17  ;;  %v1227_v31 = vpop.f32.mrf.mxu1  ;;  %v2998_v2 = vadd.f32 %v1112_v38, %v2935_v18 }
 0x205   :  { %3601 = vst [vmem:[#allocation44_spill] sm:$0xff] %v2975_v63  ;;  %v2979_v58 = vpack.c.bf16 %v1537_v21, %v1529_v37  ;;  %v1116_v59 = vpop.f32.mrf.mxu0  ;;  %v3001_v37 = vadd.f32 %v1114_v56, %v2935_v18 }
 0x206   :  { %3602 = vst [vmem:[#allocation15_spill] sm:$0xff] %v2977_v24  ;;  %v1229_v7 = vpop.f32.mrf.mxu1  ;;  %3607 = vst [vmem:[#allocation29_spill] sm:$0xff] %v2998_v2 }
 0x207   :  { %3603 = vst [vmem:[#allocation33_spill] sm:$0xff] %v2979_v58  ;;  %v1118_v33 = vpop.f32.mrf.mxu0 }
 0x208   :  { %v1231_v55 = vpop.f32.mrf.mxu1  ;;  %v2986_v39 = vadd.f32 %v1118_v33, %v2937_v50 }
 0x209   :  { %v1122_v30 = vpop.f32.mrf.mxu0  ;;  %v2989_v61 = vadd.f32 %v1231_v55, %v2937_v50 }
 0x20a   :  { %v1235_v41 = vpop.f32.mrf.mxu1  ;;  %3604 = vst [vmem:[#allocation25_spill] sm:$0xff] %v2986_v39  ;;  %v2992_v42 = vadd.f32 %v1122_v30, %v2931_v47  ;;  %v3010_v30 = vadd.f32 %v1227_v31, %v2935_v18 }
 0x20b   :  { %v1124_v19 = vpop.f32.mrf.mxu0  ;;  %3605 = vst [vmem:[#allocation16_spill] sm:$0xff] %v2989_v61 }
 0x20c   :  { %v1237_v40 = vpop.f32.mrf.mxu1  ;;  %3606 = vst [vmem:[#allocation31_spill] sm:$0xff] %v2992_v42  ;;  %v2995_v27 = vadd.f32 %v1124_v19, %v2931_v47  ;;  %v3013_v19 = vadd.f32 %v1116_v59, %v2937_v50 }
 0x20d   :  { %v1126_v60 = vpop.f32.mrf.mxu0  ;;  %v3004_v21 = vadd.f32 %v1237_v40, %v2931_v47  ;;  %v3022_v40 = vadd.f32 %v1229_v7, %v2937_v50 }
 0x20e   :  { %v1239_v29 = vpop.f32.mrf.mxu1  ;;  %v3007_v33 = vadd.f32 %v1126_v60, %v2933_v22 }
 0x20f   :  { %v1128_v11 = vpop.f32.mrf.mxu0  ;;  %v3016_v16 = vadd.f32 %v1239_v29, %v2933_v22  ;;  %3610 = vst [vmem:[#allocation35_spill] sm:$0xff] %v3022_v40  ;;  %v3031_v29 = vadd.f32 %v1235_v41, %v2931_v47 }
 0x210   :  { %v1241_v12 = vpop.f32.mrf.mxu1  ;;  %3608 = vst [vmem:[#allocation41_spill] sm:$0xff] %v3007_v33  ;;  %v3019_v38 = vadd.f32 %v1128_v11, %v2933_v22 }
 0x211   :  { %v1132_v1 = vpop.f32.mrf.mxu0  ;;  %3609 = vst [vmem:[#allocation27_spill] sm:$0xff] %v3016_v16  ;;  %v3027_v31 = vadd.f32 %v1241_v12, %v2933_v22 }
 0x212   :  { %v1245_v26 = vpop.f32.mrf.mxu1  ;;  %v3035_v28 = vadd.f32 %v1132_v1, %v2927_v45 }
 0x213   :  { %v1134_v4 = vpop.f32.mrf.mxu0 }
 0x214   :  { %v1247_v3 = vpop.f32.mrf.mxu1  ;;  %v3040_v25 = vadd.f32 %v1134_v4, %v2927_v45 }
 0x215   :  { %v1136_v5 = vpop.f32.mrf.mxu0  ;;  %v3046_v11 = vadd.f32 %v1247_v3, %v2927_v45  ;;  %v3061_v3 = vadd.f32 %v1245_v26, %v2927_v45 }
 0x216   :  { %v1249_v48 = vpop.f32.mrf.mxu1 }
 0x217   :  { %v1138_v15 = vpop.f32.mrf.mxu0  ;;  %v3078_v45 = vadd.f32 %v1249_v48, %v2929_v13 }
 0x218   :  { %v1251_v54 = vpop.f32.mrf.mxu1  ;;  %v3049_v1 = vadd.f32 %v1138_v15, %v2929_v13 }
 0x219   :  { %v1142_v36 = vpop.f32.mrf.mxu0  ;;  %v3053_v60 = vadd.f32 %v1251_v54, %v2929_v13 }
 0x21a   :  { %v2981_v53 = vpop.f32.mrf.mxu1  ;;  %v3056_v4 = vadd.f32 %v1142_v36, %v2923_v62  ;;  %v3071_v36 = vadd.f32 %v1136_v5, %v2929_v13 }
 0x21b   :  { %v1144_v10 = vpop.f32.mrf.mxu0 }
 0x21c   :  { %v1257_v43 = vpop.f32.mrf.mxu1 }
 0x21d   :  { %v1146_v52 = vpop.f32.mrf.mxu0  ;;  %v3064_v15 = vadd.f32 %v1257_v43, %v2923_v62 }
 0x21e   :  { %v2983_v20 = vpop.f32.mrf.mxu1  ;;  %v3067_v51 = vadd.f32 %v1146_v52, %v2925_v32 }
 0x21f   :  { %v1148_v14 = vpop.f32.mrf.mxu0  ;;  %v3094_v43 = vadd.f32 %v2983_v20, %v2925_v32 }
 0x220   :  { %v1261_v17 = vpop.f32.mrf.mxu1  ;;  %v1149_v12 = vadd.f32 %v1148_v14, %v2925_v32  ;;  %v1145_v14 = vadd.f32 %v1144_v10, %v2923_v62 }
 0x221   :  { %v1152_v55 = vpop.f32.mrf.mxu0  ;;  %v3074_v10 = vadd.f32 %v1261_v17, %v2925_v32  ;;  %v3088_v17 = vadd.f32 %v2981_v53, %v2923_v62 }
 0x222   :  { %v1265_v56 = vpop.f32.mrf.mxu1  ;;  %v1599_v63 = vmax.f32 %v1149_v12, 0.0  ;;  %v3082_v52 = vadd.f32 %v1152_v55, %v2919_v44  ;;  %v1591_v12 = vmax.f32 %v1145_v14, 0.0 }
 0x223   :  { %v1154_v35 = vpop.f32.mrf.mxu0  ;;  %v3101_v53 = vadd.f32 %v1265_v56, %v2919_v44 }
 0x224   :  { %v1267_v7 = vpop.f32.mrf.mxu1  ;;  %v1155_v55 = vadd.f32 %v1154_v35, %v2919_v44  ;;  %v3097_v54 = vpack.c.bf16 %v1599_v63, %v1591_v12  ;;  %v1606_v26 = vmax.f32 %v3082_v52, 0.0 }
 0x225   :  { %v1156_v22 = vpop.f32.mrf.mxu0  ;;  %v1268_v61 = vadd.f32 %v1267_v7, %v2919_v44 }
 0x226   :  { %v1269_v47 = vpop.f32.mrf.mxu1  ;;  %v1157_v14 = vadd.f32 %v1156_v22, %v2921_v9  ;;  %v1607_v22 = vmax.f32 %v1155_v55, 0.0 }
 0x227   :  { %v1158_v59 = vpop.f32.mrf.mxu0 }
 0x228   :  { %v1271_v50 = vpop.f32.mrf.mxu1  ;;  %v1159_v48 = vadd.f32 %v1158_v59, %v2921_v9  ;;  %v1614_v2 = vmax.f32 %v1157_v14, 0.0 }
 0x229   :  { %v1162_v41 = vpop.f32.mrf.mxu0  ;;  %v1272_v63 = vadd.f32 %v1271_v50, %v2921_v9 }
 0x22a   :  { %v1275_v57 = vpop.f32.mrf.mxu1  ;;  %v1163_v12 = vadd.f32 %v1162_v41, %v2915_v46  ;;  %v1615_v41 = vmax.f32 %v1159_v48, 0.0 }
 0x22b   :  { %v1164_v58 = vpop.f32.mrf.mxu0  ;;  %v1276_v52 = vadd.f32 %v1275_v57, %v2915_v46  ;;  %v1617_v55 = vmax.f32 %v1272_v63, 0.0 }
 0x22c   :  { %v1277_v13 = vpop.f32.mrf.mxu1  ;;  %v1165_v20 = vadd.f32 %v1164_v58, %v2915_v46  ;;  %v1622_v42 = vmax.f32 %v1163_v12, 0.0 }
 0x22d   :  { %v1166_v62 = vpop.f32.mrf.mxu0  ;;  %v1278_v5 = vadd.f32 %v1277_v13, %v2915_v46  ;;  %v1624_v57 = vmax.f32 %v1276_v52, 0.0 }
 0x22e   :  { %v1167_v32 = vadd.f32 %v1166_v62, %v2917_v0  ;;  %v1279_v35 = vpop.f32.mrf.mxu1  ;;  %v1270_v62 = vadd.f32 %v1269_v47, %v2921_v9  ;;  %v1623_v39 = vmax.f32 %v1165_v20, 0.0  ;;  %v1609_v9 = vmax.f32 %v1268_v61, 0.0 }
 0x22f   :  { %v1280_v56 = vadd.f32 %v1279_v35, %v2917_v0  ;;  %v1168_v24 = vpop.f32.mrf.mxu0  ;;  %v1625_v7 = vmax.f32 %v1278_v5, 0.0 }
 0x230   :  { %v1169_v59 = vadd.f32 %v1168_v24, %v2917_v0  ;;  %v1281_v58 = vpop.f32.mrf.mxu1  ;;  %v1630_v16 = vmax.f32 %v1167_v32, 0.0 }
 0x231   :  { %v1282_v50 = vadd.f32 %v1281_v58, %v2917_v0  ;;  %v1632_v13 = vmax.f32 %v1280_v56, 0.0  ;;  %v1318_v35 = vpop.f32.mrf.mxu0  ;;  %v1616_v58 = vmax.f32 %v1270_v62, 0.0  ;;  %v1688_v56 = vpack.c.bf16 %v1615_v41, %v1607_v22 }
 0x232   :  { %v1631_v40 = vmax.f32 %v1169_v59, 0.0  ;;  %v1431_v33 = vpop.f32.mrf.mxu1  ;;  %v1319_v24 = vadd.f32 %v1318_v35, %v2943_v49  ;;  %v1695_v48 = vpack.c.bf16 %v1630_v16, %v1622_v42  ;;  %v1608_v16 = vmax.f32 %v3101_v53, 0.0 }
 0x233   :  { %v1633_v44 = vmax.f32 %v1282_v50, 0.0  ;;  %v1432_v14 = vadd.f32 %v1431_v33, %v2943_v49  ;;  %v1320_v47 = vpop.f32.mrf.mxu0  ;;  %v1697_v59 = vpack.c.bf16 %v1632_v13, %v1624_v57  ;;  %v3611_v50 = vmax.f32 %v3064_v15, 0.0 }
 0x234   :  { %v1696_v46 = vpack.c.bf16 %v1631_v40, %v1623_v39  ;;  %v1433_v32 = vpop.f32.mrf.mxu1  ;;  %v1321_v0 = vadd.f32 %v1320_v47, %v2943_v49  ;;  %v1600_v39 = vmax.f32 %v3094_v43, 0.0  ;;  %v1690_v40 = vpack.c.bf16 %v1617_v55, %v1609_v9 }
 0x235   :  { %v1698_v20 = vpack.c.bf16 %v1633_v44, %v1625_v7  ;;  %v1434_v63 = vadd.f32 %v1433_v32, %v2943_v49  ;;  %v1322_v5 = vpop.f32.mrf.mxu0  ;;  %v1687_v44 = vpack.c.bf16 %v1614_v2, %v1606_v26  ;;  %v1514_v61 = vmax.f32 %v1319_v24, 0.0 }
 0x236   :  { %v1435_v12 = vpop.f32.mrf.mxu1  ;;  %1705 = vmatprep.subr.bf16.mxu0 %v1696_v46  ;;  %v1323_v33 = vadd.f32 %v1322_v5, %v2946_v8  ;;  %v1516_v42 = vmax.f32 %v1432_v14, 0.0  ;;  %v3612_v41 = vmax.f32 %v3074_v10, 0.0  ;;  %v1689_v53 = vpack.c.bf16 %v1616_v58, %v1608_v16 }
 0x237   :  { %v1436_v52 = vadd.f32 %v1435_v12, %v2946_v8  ;;  %1746 = vmatprep.subr.bf16.mxu1 %v1698_v20  ;;  %1706 = vmatpush1.bf16.msra.mxu0 %v1695_v48  ;;  %v1324_v22 = vpop.f32.mrf.mxu0  ;;  %v1515_v2 = vmax.f32 %v1321_v0, 0.0  ;;  %v1517_v26 = vmax.f32 %v1434_v63, 0.0  ;;  %v1592_v47 = vmax.f32 %v3088_v17, 0.0 }
 0x238   :  { %v1437_v62 = vpop.f32.mrf.mxu1  ;;  %1747 = vmatpush1.bf16.msra.mxu1 %v1697_v59  ;;  %1707 = vmatprep.subr.bf16.mxu0 %v1688_v56  ;;  %v1522_v49 = vmax.f32 %v1323_v33, 0.0  ;;  %v1325_v43 = vadd.f32 %v1324_v22, %v2946_v8  ;;  %v1682_v13 = vpack.c.bf16 %v3612_v41, %v3611_v50  ;;  %v1584_v58 = vmax.f32 %v3078_v45, 0.0 }
 0x239   :  { %v1524_v46 = vmax.f32 %v1436_v52, 0.0  ;;  %v1438_v9 = vadd.f32 %v1437_v62, %v2946_v8  ;;  %1748 = vmatprep.subr.bf16.mxu1 %v1690_v40  ;;  %v1328_v35 = vpop.f32.mrf.mxu0  ;;  %v1582_v8 = vmax.f32 %v3071_v36, 0.0  ;;  %v3615_v48 = vmax.f32 %v3056_v4, 0.0 }
 0x23a   :  { %v1441_v55 = vpop.f32.mrf.mxu1  ;;  %v3131_v7 = vpack.c.bf16 %v1522_v49, %v1514_v61  ;;  %v1523_v24 = vmax.f32 %v1325_v43, 0.0  ;;  %v1329_v15 = vadd.f32 %v1328_v35, %v2939_v23  ;;  %v3616_v20 = vmax.f32 %v3067_v51, 0.0 }
 0x23b   :  { %v3133_v57 = vpack.c.bf16 %v1524_v46, %v1516_v42  ;;  %v1525_v14 = vmax.f32 %v1438_v9, 0.0  ;;  %1708 = vmatpush1.bf16.msra.mxu0 %v1687_v44  ;;  %v1442_v10 = vadd.f32 %v1441_v55, %v2939_v23  ;;  %v1330_v32 = vpop.f32.mrf.mxu0  ;;  %v3619_v17 = vmax.f32 %v3040_v25, 0.0 }
 0x23c   :  { %3613 = vst [vmem:[#allocation43_spill] sm:$0xff] %v3131_v7  ;;  %v1443_v0 = vpop.f32.mrf.mxu1  ;;  %1749 = vmatpush1.bf16.msra.mxu1 %v1689_v53  ;;  %1709 = vmatprep.subr.bf16.mxu0 %v3097_v54  ;;  %v1679_v56 = vpack.c.bf16 %v3616_v20, %v3615_v48  ;;  %v3145_v59 = vpack.c.bf16 %v1523_v24, %v1515_v2  ;;  %v3620_v63 = vmax.f32 %v3049_v1, 0.0  ;;  %v3621_v51 = vmax.f32 %v2995_v27, 0.0  ;;  %v3639_v48 = vld [vmem:[#allocation25_spill] sm:$0xff] }
 0x23d   :  { %3614 = vst [vmem:[#allocation30_spill] sm:$0xff] %v3133_v57  ;;  %v3147_v36 = vpack.c.bf16 %v1525_v14, %v1517_v26  ;;  %1750 = vmatprep.subr.bf16.mxu1 %v1682_v13  ;;  %v1681_v12 = vpack.c.bf16 %v1600_v39, %v1592_v47  ;;  %v1331_v54 = vadd.f32 %v1330_v32, %v2939_v23  ;;  %v1332_v40 = vpop.f32.mrf.mxu0  ;;  %v3622_v33 = vmax.f32 %v3019_v38, 0.0  ;;  %v3634_v32 = vld [vmem:[#allocation41_spill] sm:$0xff]  ;;  %v3669_v57 = vld [vmem:[#allocation20_spill] sm:$0xff] }
 0x23e   :  { %3617 = vst [vmem:[#allocation40_spill] sm:$0xff] %v3145_v59  ;;  %v1672_v5 = vpack.c.bf16 %v3620_v63, %v3619_v17  ;;  %v1444_v45 = vadd.f32 %v1443_v0, %v2939_v23  ;;  %v1445_v4 = vpop.f32.mrf.mxu1  ;;  %v3623_v16 = vmax.f32 %v3046_v11, 0.0  ;;  %v3624_v44 = vmax.f32 %v3053_v60, 0.0  ;;  %v3641_v17 = vld [vmem:[#allocation27_spill] sm:$0xff]  ;;  %v3670_v7 = vld [vmem:[#allocation21_spill] sm:$0xff] }
 0x23f   :  { %3618 = vst [vmem:[#allocation42_spill] sm:$0xff] %v3147_v36  ;;  %v1664_v52 = vpack.c.bf16 %v3622_v33, %v3621_v51  ;;  %v1333_v1 = vadd.f32 %v1332_v40, %v2941_v6  ;;  %v1446_v39 = vadd.f32 %v1445_v4, %v2941_v6  ;;  %1710 = vmatpush1.bf16.msra.mxu0 %v1679_v56  ;;  %v1576_v61 = vmax.f32 %v3061_v3, 0.0  ;;  %v1334_v62 = vpop.f32.mrf.mxu0  ;;  %v3646_v40 = vld [vmem:[#allocation16_spill] sm:$0xff]  ;;  %v3671_v36 = vld [vmem:[#allocation23_spill] sm:$0xff] }
 0x240   :  { %v1674_v25 = vpack.c.bf16 %v3624_v44, %v3623_v16  ;;  %v3625_v23 = vmax.f32 %v3035_v28, 0.0  ;;  %v1530_v22 = vmax.f32 %v1329_v15, 0.0  ;;  %v1532_v27 = vmax.f32 %v1442_v10, 0.0  ;;  %v1447_v38 = vpop.f32.mrf.mxu1  ;;  %1751 = vmatpush1.bf16.msra.mxu1 %v1681_v12  ;;  %1711 = vmatprep.subr.bf16.mxu0 %v1672_v5  ;;  %v3632_v15 = vld [vmem:[#allocation31_spill] sm:$0xff] }
 0x241   :  { %v1538_v11 = vmax.f32 %v1333_v1, 0.0  ;;  %v1540_v49 = vmax.f32 %v1446_v39, 0.0  ;;  %v1335_v60 = vadd.f32 %v1334_v62, %v2941_v6  ;;  %v1448_v46 = vadd.f32 %v1447_v38, %v2941_v6  ;;  %v3174_v13 = vpop.f32.mrf.mxu0  ;;  %v3650_v38 = vld [vmem:[#allocation6_spill] sm:$0xff] }
 0x242   :  { %v1671_v42 = vpack.c.bf16 %v1582_v8, %v3625_v23  ;;  %1752 = vmatprep.subr.bf16.mxu1 %v1674_v25  ;;  %v3626_v43 = vmax.f32 %v3004_v21, 0.0  ;;  %v3627_v3 = vmax.f32 %v3027_v31, 0.0  ;;  %v1673_v28 = vpack.c.bf16 %v1584_v58, %v1576_v61  ;;  %3628 = vst [vmem:[#allocation38_spill] sm:$0xff] %v3174_v13  ;;  %v3176_v53 = vpop.f32.mrf.mxu1 }
 0x243   :  { %v1531_v50 = vmax.f32 %v1331_v54, 0.0  ;;  %v1533_v41 = vmax.f32 %v1444_v45, 0.0  ;;  %3629 = vst [vmem:[#allocation39_spill] sm:$0xff] %v3176_v53  ;;  %v3178_v2 = vpack.c.bf16 %v1538_v11, %v1530_v22  ;;  %v3180_v26 = vpack.c.bf16 %v1540_v49, %v1532_v27  ;;  %v3187_v14 = vpop.f32.mrf.mxu0  ;;  %v3645_v54 = vld [vmem:[#allocation29_spill] sm:$0xff] }
 0x244   :  { %v1666_v9 = vpack.c.bf16 %v3627_v3, %v3626_v43  ;;  %v1539_v35 = vmax.f32 %v1335_v60, 0.0  ;;  %v1541_v55 = vmax.f32 %v1448_v46, 0.0  ;;  %1712 = vmatpush1.bf16.msra.mxu0 %v1671_v42  ;;  %v1226_v6 = vadd.f32 %v2973_v34, %v2935_v18  ;;  %v3189_v8 = vpop.f32.mrf.mxu1  ;;  %1753 = vmatpush1.bf16.msra.mxu1 %v1673_v28  ;;  %v3648_v42 = vld [vmem:[#allocation15_spill] sm:$0xff]  ;;  %v3649_v22 = vld [vmem:[#allocation33_spill] sm:$0xff]  ;;  %v3651_v60 = vld [vmem:[#allocation44_spill] sm:$0xff] }
 0x245   :  { %3630 = vst [vmem:[#allocation36_spill] sm:$0xff] %v3178_v2  ;;  %3631 = vst [vmem:[#allocation37_spill] sm:$0xff] %v3180_v26  ;;  %v1543_v21 = vmax.f32 %v3001_v37, 0.0  ;;  %v1545_v31 = vmax.f32 %v3010_v30, 0.0  ;;  %v1560_v24 = vmax.f32 %v3031_v29, 0.0  ;;  %1713 = vmatprep.subr.bf16.mxu0 %v1664_v52  ;;  %v1550_v47 = vmax.f32 %v3013_v19, 0.0  ;;  %v3205_v12 = vpop.f32.mrf.mxu0 }
 0x246   :  { %v3633_v10 = vmax.f32 %v3632_v15, 0.0  ;;  %v3635_v0 = vmax.f32 %v3634_v32, 0.0  ;;  %v3196_v34 = vpack.c.bf16 %v1539_v35, %v1531_v50  ;;  %v3198_v37 = vpack.c.bf16 %v1541_v55, %v1533_v41  ;;  %1754 = vmatprep.subr.bf16.mxu1 %v1666_v9  ;;  %v3638_v30 = vld [vmem:[#allocation35_spill] sm:$0xff]  ;;  %3643 = vst [vmem:[#allocation17_spill] sm:$0xff] %v3205_v12  ;;  %v3207_v19 = vpop.f32.mrf.mxu1  ;;  %v3653_v43 = vld [vmem:[#allocation8_spill] sm:$0xff]  ;;  %v3654_v28 = vld [vmem:[#allocation9_spill] sm:$0xff] }
 0x247   :  { %v1552_v29 = vmax.f32 %v3638_v30, 0.0  ;;  %v3640_v20 = vmax.f32 %v3639_v48, 0.0  ;;  %v3642_v63 = vmax.f32 %v3641_v17, 0.0  ;;  %3644 = vst [vmem:[#allocation32_spill] sm:$0xff] %v3207_v19  ;;  %v1542_v45 = vmax.f32 %v3645_v54, 0.0  ;;  %v1344_v52 = vpop.f32.mrf.mxu0  ;;  %v3652_v46 = vld [vmem:[#allocation7_spill] sm:$0xff] }
 0x248   :  { %v1663_v58 = vpack.c.bf16 %v3635_v0, %v3633_v10  ;;  %3636 = vst [vmem:[#allocation34_spill] sm:$0xff] %v3196_v34  ;;  %3637 = vst [vmem:[#allocation28_spill] sm:$0xff] %v3198_v37  ;;  %v3647_v4 = vmax.f32 %v3646_v40, 0.0  ;;  %v1544_v33 = vmax.f32 %v1226_v6, 0.0  ;;  %v1457_v16 = vpop.f32.mrf.mxu1  ;;  %v3234_v50 = vld [vmem:[%s3388_s5] sm:$0x1] }
 0x249   :  { %v1656_v56 = vpack.c.bf16 %v3640_v20, %v1543_v21  ;;  %v1665_v5 = vpack.c.bf16 %v3642_v63, %v1560_v24  ;;  %v1655_v44 = vpack.c.bf16 %v1550_v47, %v1542_v45  ;;  %v3212_v1 = vpop.f32.mrf.mxu0  ;;  %3655 = vst [vmem:[#allocation31_spill] sm:$0xff] %v3234_v50  ;;  %v3656_v55 = vld [vmem:[#allocation10_spill] sm:$0xff]  ;;  %v3673_v34 = vld [vmem:[#allocation24_spill] sm:$0xff] }
 0x24a   :  { %v1658_v51 = vpack.c.bf16 %v3647_v4, %v1545_v31  ;;  %1714 = vmatpush1.bf16.msra.mxu0 %v1663_v58  ;;  %v1657_v25 = vpack.c.bf16 %v1552_v29, %v1544_v33  ;;  %v3214_v39 = vpop.f32.mrf.mxu1  ;;  %v3657_v31 = vmov 0   ;;  %v3251_v4 = vadd.f32 %v3187_v14, %v2935_v18  ;;  %v3660_v33 = vld [vmem:[#allocation12_spill] sm:$0xff]  ;;  %v3666_v14 = vld [vmem:[#allocation14_spill] sm:$0xff] }
 0x24b   :  { %1755 = vmatpush1.bf16.msra.mxu1 %v1665_v5  ;;  %1715 = vmatprep.subr.bf16.mxu0 %v1656_v56  ;;  %v1350_v61 = vpop.f32.mrf.mxu0 }
 0x24c   :  { %1756 = vmatprep.subr.bf16.mxu1 %v1658_v51  ;;  %v1463_v23 = vpop.f32.mrf.mxu1  ;;  %3658 = vst [vmem:[#allocation41_spill] sm:$0xff] %v3251_v4  ;;  %v3255_v51 = vadd.f32 %v3189_v8, %v2935_v18  ;;  %v3674_v4 = vld [vmem:[#allocation22_spill] sm:$0xff] }
 0x24d   :  { %v3218_v27 = vpop.f32.mrf.mxu0 }
 0x24e   :  { %1716 = vmatpush1.bf16.msra.mxu0 %v1655_v44  ;;  %v3220_v62 = vpop.f32.mrf.mxu1  ;;  %3659 = vst [vmem:[#allocation35_spill] sm:$0xff] %v3255_v51  ;;  %v3258_v44 = vadd.f32 %v1344_v52, %v3660_v33 }
 0x24f   :  { %1757 = vmatpush1.bf16.msra.mxu1 %v1657_v25  ;;  %1717 = vmatprep.subr.bf16.mxu0 %v3648_v42  ;;  %v1354_v11 = vpop.f32.mrf.mxu0  ;;  %v3261_v25 = vadd.f32 %v1457_v16, %v3660_v33 }
 0x250   :  { %1758 = vmatprep.subr.bf16.mxu1 %v3649_v22  ;;  %v1467_v49 = vpop.f32.mrf.mxu1  ;;  %3661 = vst [vmem:[#allocation25_spill] sm:$0xff] %v3258_v44 }
 0x251   :  { %v3226_v3 = vpop.f32.mrf.mxu0  ;;  %3662 = vst [vmem:[#allocation27_spill] sm:$0xff] %v3261_v25  ;;  %v3273_v8 = vadd.f32 %v1467_v49, %v3666_v14 }
 0x252   :  { %1718 = vmatpush1.bf16.msra.mxu0 %v3650_v38  ;;  %v3228_v9 = vpop.f32.mrf.mxu1  ;;  %v3663_v38 = vld [vmem:[#allocation13_spill] sm:$0xff] }
 0x253   :  { %1759 = vmatpush1.bf16.msra.mxu1 %v3651_v60  ;;  %1719 = vmatprep.subr.bf16.mxu0 %v3652_v46  ;;  %v1360_v41 = vpop.f32.mrf.mxu0  ;;  %v3264_v60 = vadd.f32 %v1350_v61, %v3663_v38  ;;  %v3267_v46 = vadd.f32 %v1463_v23, %v3663_v38 }
 0x254   :  { %1760 = vmatprep.subr.bf16.mxu1 %v3653_v43  ;;  %v1473_v35 = vpop.f32.mrf.mxu1  ;;  %v3270_v43 = vadd.f32 %v1354_v11, %v3666_v14 }
 0x255   :  { %v3237_v6 = vpop.f32.mrf.mxu0  ;;  %3664 = vst [vmem:[#allocation29_spill] sm:$0xff] %v3264_v60  ;;  %3665 = vst [vmem:[#allocation16_spill] sm:$0xff] %v3267_v46 }
 0x256   :  { %1720 = vmatpush1.bf16.msra.mxu0 %v3654_v28  ;;  %v3239_v21 = vpop.f32.mrf.mxu1  ;;  %v3667_v28 = vld [vmem:[#allocation18_spill] sm:$0xff] }
 0x257   :  { %1761 = vmatpush1.bf16.msra.mxu1 %v3656_v55  ;;  %v1364_v24 = vpop.f32.mrf.mxu0  ;;  %v3276_v52 = vadd.f32 %v1360_v41, %v3667_v28  ;;  %v3279_v16 = vadd.f32 %v1473_v35, %v3667_v28  ;;  %v3668_v55 = vld [vmem:[#allocation19_spill] sm:$0xff] }
 0x258   :  { %v1477_v47 = vpop.f32.mrf.mxu1 }
 0x259   :  { %1738 = vmatmul.mubr.bf16.vlgmr.msra.gmra.mxu0 %v3234_v50  ;;  %v3245_v15 = vpop.f32.mrf.mxu0  ;;  %v3285_v61 = vadd.f32 %v1477_v47, %v3668_v55 }
 0x25a   :  { %1779 = vmatmul.mubr.bf16.vlgmr.msra.gmra.mxu1 %v3234_v50  ;;  %1819 = vmatprep.mubr.bf16.mxu0 %v3657_v31  ;;  %v3247_v10 = vpop.f32.mrf.mxu1 }
 0x25b   :  { %1860 = vmatprep.mubr.bf16.mxu1 %v3657_v31  ;;  %v1370_v32 = vpop.f32.mrf.mxu0  ;;  %v3282_v31 = vadd.f32 %v1364_v24, %v3668_v55 }
 0x25c   :  { %v1483_v0 = vpop.f32.mrf.mxu1  ;;  %v3288_v11 = vadd.f32 %v1370_v32, %v3669_v57 }
 0x25d   :  { %v1372_v58 = vpop.f32.mrf.mxu0  ;;  %v3291_v49 = vadd.f32 %v1483_v0, %v3669_v57  ;;  %v3672_v0 = vld [vmem:[#allocation26_spill] sm:$0xff] }
 0x25e   :  { %v1485_v30 = vpop.f32.mrf.mxu1  ;;  %v3294_v41 = vadd.f32 %v1372_v58, %v3670_v7 }
 0x25f   :  { %v1374_v29 = vpop.f32.mrf.mxu0  ;;  %v3297_v35 = vadd.f32 %v1485_v30, %v3670_v7 }
 0x260   :  { %v1487_v48 = vpop.f32.mrf.mxu1  ;;  %v3300_v24 = vadd.f32 %v1374_v29, %v3670_v7 }
 0x261   :  { %v1378_v20 = vpop.f32.mrf.mxu0  ;;  %v3303_v47 = vadd.f32 %v1487_v48, %v3670_v7 }
 0x262   :  { %v1491_v56 = vpop.f32.mrf.mxu1 }
 0x263   :  { %v1380_v17 = vpop.f32.mrf.mxu0 }
 0x264   :  { %v1493_v63 = vpop.f32.mrf.mxu1  ;;  %v1381_v29 = vadd.f32 %v1380_v17, %v3674_v4 }
 0x265   :  { %v1382_v5 = vpop.f32.mrf.mxu0  ;;  %v1494_v53 = vadd.f32 %v1493_v63, %v3674_v4 }
 0x266   :  { %v1495_v54 = vpop.f32.mrf.mxu1  ;;  %v1383_v13 = vadd.f32 %v1382_v5, %v3671_v36  ;;  %v1611_v19 = vmax.f32 %v1381_v29, 0.0  ;;  %v1573_v29 = vmax.f32 %v3273_v8, 0.0 }
 0x267   :  { %v1384_v45 = vpop.f32.mrf.mxu0 }
 0x268   :  { %v1497_v40 = vpop.f32.mrf.mxu1  ;;  %v1385_v59 = vadd.f32 %v1384_v45, %v3671_v36  ;;  %v1618_v12 = vmax.f32 %v1383_v13, 0.0  ;;  %v1363_v13 = vadd.f32 %v3237_v6, %v3668_v55 }
 0x269   :  { %v1388_v42 = vpop.f32.mrf.mxu0  ;;  %v1498_v32 = vadd.f32 %v1497_v40, %v3671_v36 }
 0x26a   :  { %v1501_v22 = vpop.f32.mrf.mxu1  ;;  %v1389_v7 = vadd.f32 %v1388_v42, %v3672_v0  ;;  %v1619_v18 = vmax.f32 %v1385_v59, 0.0 }
 0x26b   :  { %v1390_v23 = vpop.f32.mrf.mxu0  ;;  %v1502_v48 = vadd.f32 %v1501_v22, %v3672_v0  ;;  %v1379_v22 = vadd.f32 %v1378_v20, %v3674_v4  ;;  %v1369_v20 = vadd.f32 %v3245_v15, %v3669_v57  ;;  %v1602_v15 = vmax.f32 %v3294_v41, 0.0 }
 0x26c   :  { %v1503_v50 = vpop.f32.mrf.mxu1  ;;  %v1391_v37 = vadd.f32 %v1390_v23, %v3672_v0  ;;  %v1496_v23 = vadd.f32 %v1495_v54, %v3671_v36  ;;  %v1626_v60 = vmax.f32 %v1389_v7, 0.0  ;;  %v1613_v36 = vmax.f32 %v1494_v53, 0.0 }
 0x26d   :  { %v1392_v26 = vpop.f32.mrf.mxu0  ;;  %v1504_v58 = vadd.f32 %v1503_v50, %v3672_v0  ;;  %v1492_v0 = vadd.f32 %v1491_v56, %v3674_v4  ;;  %v1628_v5 = vmax.f32 %v1502_v48, 0.0  ;;  %v1482_v53 = vadd.f32 %v3247_v10, %v3669_v57 }
 0x26e   :  { %v1505_v2 = vpop.f32.mrf.mxu1  ;;  %v1393_v51 = vadd.f32 %v1392_v26, %v3673_v34  ;;  %v1627_v44 = vmax.f32 %v1391_v37, 0.0  ;;  %v1605_v37 = vmax.f32 %v3303_v47, 0.0  ;;  %v1610_v56 = vmax.f32 %v1379_v22, 0.0  ;;  %v3680_v22 = vld [vmem:[#allocation27_spill] sm:$0xff] }
 0x26f   :  { %v1506_v30 = vadd.f32 %v1505_v2, %v3673_v34  ;;  %v1394_v45 = vpop.f32.mrf.mxu0  ;;  %v1621_v2 = vmax.f32 %v1498_v32, 0.0  ;;  %v1629_v63 = vmax.f32 %v1504_v58, 0.0  ;;  %v1692_v58 = vpack.c.bf16 %v1619_v18, %v1611_v19 }
 0x270   :  { %v1507_v40 = vpop.f32.mrf.mxu1  ;;  %v1395_v50 = vadd.f32 %v1394_v45, %v3673_v34  ;;  %v1634_v25 = vmax.f32 %v1393_v51, 0.0  ;;  %v1603_v51 = vmax.f32 %v3300_v24, 0.0  ;;  %v1612_v4 = vmax.f32 %v1492_v0, 0.0 }
 0x271   :  { %v1508_v26 = vadd.f32 %v1507_v40, %v3673_v34  ;;  %v1636_v17 = vmax.f32 %v1506_v30, 0.0  ;;  %v1620_v34 = vmax.f32 %v1496_v23, 0.0  ;;  %v1694_v30 = vpack.c.bf16 %v1621_v2, %v1613_v36  ;;  %v3676_v23 = vld [vmem:[#allocation32_spill] sm:$0xff] }
 0x272   :  { %v1635_v46 = vmax.f32 %v1395_v50, 0.0  ;;  %v1699_v59 = vpack.c.bf16 %v1634_v25, %v1626_v60  ;;  %v1595_v18 = vmax.f32 %v3288_v11, 0.0  ;;  %v1597_v19 = vmax.f32 %v3291_v49, 0.0  ;;  %v3677_v50 = vld [vmem:[#allocation29_spill] sm:$0xff] }
 0x273   :  { %v1637_v42 = vmax.f32 %v1508_v26, 0.0  ;;  %v1701_v32 = vpack.c.bf16 %v1636_v17, %v1628_v5  ;;  %v1604_v57 = vmax.f32 %v3297_v35, 0.0  ;;  %v1691_v10 = vpack.c.bf16 %v1618_v12, %v1610_v56  ;;  %v3678_v26 = vld [vmem:[#allocation16_spill] sm:$0xff] }
 0x274   :  { %v1700_v54 = vpack.c.bf16 %v1635_v46, %v1627_v44  ;;  %v1476_v44 = vadd.f32 %v3239_v21, %v3668_v55  ;;  %v1693_v25 = vpack.c.bf16 %v1620_v34, %v1612_v4  ;;  %v1587_v60 = vmax.f32 %v3282_v31, 0.0 }
 0x275   :  { %v1702_v45 = vpack.c.bf16 %v1637_v42, %v1629_v63  ;;  %v1589_v46 = vmax.f32 %v3285_v61, 0.0  ;;  %v1684_v6 = vpack.c.bf16 %v1603_v51, %v1595_v18  ;;  %v1686_v24 = vpack.c.bf16 %v1605_v37, %v1597_v19  ;;  %v3684_v37 = vld [vmem:[#allocation41_spill] sm:$0xff] }
 0x276   :  { %1787 = vmatprep.subr.bf16.mxu0 %v1700_v54  ;;  %v1359_v21 = vadd.f32 %v3226_v3, %v3667_v28  ;;  %v1472_v55 = vadd.f32 %v3228_v9, %v3667_v28  ;;  %v1594_v11 = vmax.f32 %v1369_v20, 0.0  ;;  %v1596_v49 = vmax.f32 %v1482_v53, 0.0  ;;  %v3681_v54 = vld [vmem:[#allocation11_spill] sm:$0xff] }
 0x277   :  { %1828 = vmatprep.subr.bf16.mxu1 %v1702_v45  ;;  %1788 = vmatpush1.bf16.msra.mxu0 %v1699_v59  ;;  %v1353_v12 = vadd.f32 %v3218_v27, %v3666_v14  ;;  %v1466_v31 = vadd.f32 %v3220_v62, %v3666_v14  ;;  %v1579_v61 = vmax.f32 %v3276_v52, 0.0  ;;  %v1581_v41 = vmax.f32 %v3279_v16, 0.0  ;;  %v3675_v16 = vld [vmem:[#allocation17_spill] sm:$0xff]  ;;  %v3682_v45 = vld [vmem:[#allocation38_spill] sm:$0xff] }
 0x278   :  { %1829 = vmatpush1.bf16.msra.mxu1 %v1701_v32  ;;  %1789 = vmatprep.subr.bf16.mxu0 %v1692_v58  ;;  %v1586_v3 = vmax.f32 %v1363_v13, 0.0  ;;  %v1588_v35 = vmax.f32 %v1476_v44, 0.0  ;;  %v1683_v47 = vpack.c.bf16 %v1602_v15, %v1594_v11  ;;  %v1685_v9 = vpack.c.bf16 %v1604_v57, %v1596_v49  ;;  %v3693_v11 = vld [vmem:[#allocation30_spill] sm:$0xff]  ;;  %v3694_v49 = vld [vmem:[#allocation31_spill] sm:$0xff] }
 0x279   :  { %1830 = vmatprep.subr.bf16.mxu1 %v1694_v30  ;;  %v1571_v28 = vmax.f32 %v3270_v43, 0.0  ;;  %v1676_v7 = vpack.c.bf16 %v1587_v60, %v1579_v61  ;;  %v1678_v48 = vpack.c.bf16 %v1589_v46, %v1581_v41  ;;  %v1349_v27 = vadd.f32 %v3212_v1, %v3663_v38  ;;  %v3685_v30 = vld [vmem:[#allocation35_spill] sm:$0xff]  ;;  %v3687_v60 = vld [vmem:[#allocation28_spill] sm:$0xff] }
 0x27a   :  { %v1462_v62 = vadd.f32 %v3214_v39, %v3663_v38  ;;  %v1578_v14 = vmax.f32 %v1359_v21, 0.0  ;;  %v1580_v52 = vmax.f32 %v1472_v55, 0.0  ;;  %v1343_v40 = vadd.f32 %v3675_v16, %v3660_v33  ;;  %v3679_v38 = vld [vmem:[#allocation25_spill] sm:$0xff]  ;;  %v3688_v46 = vld [vmem:[#allocation36_spill] sm:$0xff]  ;;  %v3691_v21 = vld [vmem:[#allocation42_spill] sm:$0xff] }
 0x27b   :  { %1790 = vmatpush1.bf16.msra.mxu0 %v1691_v10  ;;  %v1456_v43 = vadd.f32 %v3676_v23, %v3660_v33  ;;  %v1563_v8 = vmax.f32 %v3677_v50, 0.0  ;;  %v1565_v2 = vmax.f32 %v3678_v26, 0.0  ;;  %v1570_v1 = vmax.f32 %v1353_v12, 0.0  ;;  %v3683_v33 = vld [vmem:[#allocation39_spill] sm:$0xff] }
 0x27c   :  { %1831 = vmatpush1.bf16.msra.mxu1 %v1693_v25  ;;  %1791 = vmatprep.subr.bf16.mxu0 %v1684_v6  ;;  %v1572_v17 = vmax.f32 %v1466_v31, 0.0  ;;  %v1675_v63 = vpack.c.bf16 %v1586_v3, %v1578_v14  ;;  %v1677_v39 = vpack.c.bf16 %v1588_v35, %v1580_v52  ;;  %v1555_v42 = vmax.f32 %v3679_v38, 0.0  ;;  %v3686_v25 = vld [vmem:[#allocation34_spill] sm:$0xff]  ;;  %v3689_v6 = vld [vmem:[#allocation37_spill] sm:$0xff]  ;;  %v3692_v55 = vld [vmem:[#allocation43_spill] sm:$0xff] }
 0x27d   :  { %1832 = vmatprep.subr.bf16.mxu1 %v1686_v24  ;;  %v1557_v0 = vmax.f32 %v3680_v22, 0.0  ;;  %v1668_v5 = vpack.c.bf16 %v1571_v28, %v1563_v8  ;;  %v1670_v36 = vpack.c.bf16 %v1573_v29, %v1565_v2  ;;  %v1339_v34 = vadd.f32 %v3682_v45, %v3681_v54  ;;  %v3690_v24 = vld [vmem:[#allocation40_spill] sm:$0xff] }
 0x27e   :  { %v1452_v59 = vadd.f32 %v3683_v33, %v3681_v54  ;;  %v1562_v32 = vmax.f32 %v1349_v27, 0.0  ;;  %v1564_v51 = vmax.f32 %v1462_v62, 0.0  ;;  %v1547_v58 = vmax.f32 %v3684_v37, 0.0 }
 0x27f   :  { %1792 = vmatpush1.bf16.msra.mxu0 %v1683_v47  ;;  %v1549_v20 = vmax.f32 %v3685_v30, 0.0  ;;  %v1554_v53 = vmax.f32 %v1343_v40, 0.0  ;;  %v1556_v56 = vmax.f32 %v1456_v43, 0.0  ;;  %v1546_v19 = vmax.f32 %v1339_v34, 0.0 }
 0x280   :  { %1833 = vmatpush1.bf16.msra.mxu1 %v1685_v9  ;;  %1793 = vmatprep.subr.bf16.mxu0 %v1676_v7  ;;  %v1667_v4 = vpack.c.bf16 %v1570_v1, %v1562_v32  ;;  %v1669_v13 = vpack.c.bf16 %v1572_v17, %v1564_v51  ;;  %v1660_v44 = vpack.c.bf16 %v1555_v42, %v1547_v58  ;;  %v1548_v15 = vmax.f32 %v1452_v59, 0.0 }
 0x281   :  { %1834 = vmatprep.subr.bf16.mxu1 %v1678_v48  ;;  %v1662_v18 = vpack.c.bf16 %v1557_v0, %v1549_v20  ;;  %v1659_v57 = vpack.c.bf16 %v1554_v53, %v1546_v19  ;;  %v2042_v12 = vmov 1966171168   ;;  %v1884_v61 = vlaneseq }
 0x282   :  { %v1661_v10 = vpack.c.bf16 %v1556_v56, %v1548_v15  ;;  %v1882_v31 = vunpack.c.l.s4 %v2042_v12  ;;  %v1704_v41 = vstv %s3389_s6  ;;  %s2043_s6 = smov [#allocation3]  }
 0x283   :  { %1794 = vmatpush1.bf16.msra.mxu0 %v1675_v63  ;;  %v1885_v35 = vshrl.u32 %v1884_v61, 7  ;;  %s1934_s2 = sshll.u32 %s2043_s6, 4  ;;  %s1935_s2 = int_to_ptr.vmem [resolvable:$true] %s1934_s2 }
 0x284   :  { %1835 = vmatpush1.bf16.msra.mxu1 %v1677_v39  ;;  %1795 = vmatprep.subr.bf16.mxu0 %v1668_v5  ;;  %v1883_v3 = vunpack.c.0.s8 %v1882_v31  ;;  %s2019_s15 = scalar_lea.vmem %s1935_s2, 128  ;;  %p2024_p1 = scmp.lt.s32.totalorder %s1935_s2, %s1935_s2 }
 0x285   :  { %1836 = vmatprep.subr.bf16.mxu1 %v1670_v36  ;;  %p2020_p0 = scmp.ne.s32.totalorder %s1935_s2, %s2019_s15  ;;  %p2025_p2 = scmp.lt.s32.totalorder %s2019_s15, %s2019_s15 }
 0x286   :  { %v1886_v27 = vsub.s32 %v1883_v3, %v1885_v35 }
 0x287   :  { %1796 = vmatpush1.bf16.msra.mxu0 %v1667_v4  ;;  %p2026_p3 = por %p2025_p2, %p2024_p1 }
 0x288   :  { %1837 = vmatpush1.bf16.msra.mxu1 %v1669_v13  ;;  %1797 = vmatprep.subr.bf16.mxu0 %v1660_v44 }
 0x289   :  { %1838 = vmatprep.subr.bf16.mxu1 %v1662_v18  ;;  %p2027_p4 = pnand %p2026_p3, %p2020_p0 }
 0x28b   :  { %1798 = vmatpush1.bf16.msra.mxu0 %v1659_v57 }
 0x28c   :  { %1839 = vmatpush1.bf16.msra.mxu1 %v1661_v10  ;;  %1799 = vmatprep.subr.bf16.mxu0 %v3686_v25 }
 0x28d   :  { %1840 = vmatprep.subr.bf16.mxu1 %v3687_v60 }
 0x28f   :  { %1800 = vmatpush1.bf16.msra.mxu0 %v3688_v46 }
 0x290   :  { %1841 = vmatpush1.bf16.msra.mxu1 %v3689_v6  ;;  %1801 = vmatprep.subr.bf16.mxu0 %v3690_v24 }
 0x291   :  { %1842 = vmatprep.subr.bf16.mxu1 %v3691_v21 }
 0x293   :  { %1802 = vmatpush1.bf16.msra.mxu0 %v3692_v55 }
 0x294   :  { %1843 = vmatpush1.bf16.msra.mxu1 %v3693_v11 }
 0x296   :  { %1820 = vmatmul.mubr.bf16.vlgmr.msra.gmra.mxu0 %v3694_v49 }
 0x297   :  { %1861 = vmatmul.mubr.bf16.vlgmr.msra.gmra.mxu1 %v3694_v49 }
 0x319   :  { %v1739_v47 = vpop.f32.mrf.mxu0 }
 0x31a   :  { %v1740_v9 = vadd.f32 %v1739_v47, %v1704_v41  ;;  %v1780_v28 = vpop.f32.mrf.mxu1 }
 0x31b   :  { %v1781_v29 = vadd.f32 %v1780_v28, %v1704_v41  ;;  %v1741_v7 = vpop.f32.mrf.mxu0 }
 0x31c   :  { %v1742_v48 = vadd.f32 %v1741_v7, %v1704_v41  ;;  %v1782_v62 = vpop.f32.mrf.mxu1 }
 0x31d   :  { %v1783_v14 = vadd.f32 %v1782_v62, %v1704_v41  ;;  %v1743_v52 = vpop.f32.mrf.mxu0 }
 0x31e   :  { %v1877_v16 = vcombine.low %v1740_v9, %v1742_v48  ;;  %v1784_v40 = vpop.f32.mrf.mxu1 }
 0x31f   :  { %v1878_v23 = vcombine.low %v1781_v29, %v1783_v14  ;;  %v1744_v43 = vpop.f32.mrf.mxu0 }
 0x320   :  { %v1887_v50 = vrot.slane %v1877_v16, %v1886_v27  ;;  %v1785_v8 = vpop.f32.mrf.mxu1 }
 0x321   :  { %v1894_v26 = vrot.slane %v1878_v23, %v1886_v27 }
 0x323   :  { %v1909_v2 = vcombine.low %v1887_v50, %v1894_v26 }
 0x325   :  { %v1917_v37 = vrot.slane %v1909_v2, %v1886_v27 }
 0x356   :  { %v1821_v1 = vpop.f32.mrf.mxu0 }
 0x357   :  { %v1862_v17 = vpop.f32.mrf.mxu1  ;;  %v1822_v38 = vadd.f32 %v1821_v1, %v1704_v41 }
 0x358   :  { %v1823_v63 = vpop.f32.mrf.mxu0  ;;  %v1863_v42 = vadd.f32 %v1862_v17, %v1704_v41 }
 0x359   :  { %v1864_v39 = vpop.f32.mrf.mxu1  ;;  %v1824_v22 = vadd.f32 %v1823_v63, %v1704_v41 }
 0x35a   :  { %v1865_v0 = vadd.f32 %v1864_v39, %v1704_v41  ;;  %v1825_v5 = vpop.f32.mrf.mxu0 }
 0x35b   :  { %v1866_v36 = vpop.f32.mrf.mxu1  ;;  %v1879_v54 = vcombine.low %v1822_v38, %v1824_v22 }
 0x35c   :  { %v1880_v45 = vcombine.low %v1863_v42, %v1865_v0  ;;  %v1826_v34 = vpop.f32.mrf.mxu0 }
 0x35d   :  { %v1867_v33 = vpop.f32.mrf.mxu1  ;;  %v1901_v59 = vrot.slane %v1879_v54, %v1886_v27 }
 0x35e   :  { %v1908_v32 = vrot.slane %v1880_v45, %v1886_v27 }
 0x360   :  { %v1910_v51 = vcombine.low %v1901_v59, %v1908_v32 }
 0x362   :  { %v1924_v58 = vrot.slane %v1910_v51, %v1886_v27 }
 0x364   :  { %v1925_v30 = vcombine.low %v1917_v37, %v1924_v58 }
 0x366   :  { %1927 = vst [vmem:[#allocation3] sm:$0xff] %v1925_v30 }
 0x367   :  { %2030 = shalt.err (!%p2027_p4)
}
 0x368   :  { %1937 = dma.vmem_to_hbm [thread:$0]  %s1935_s2, 128, %s3390_s7, [#allocation4]  }
 0x369   :  { %2039 = dma.done.wait [#allocation4], 128  }
 0x36a   :  { %2040 = vsyncadd [#allocation4], 4294967168 }
 0x36b   :  { %1941 = vsyncpa [#allocation4], 1 }

</bundles_post_ra>
